<compile_context>
chip_gen: v6e
topology: v6e:2x2x1
jax: 0.10.0
libtpu: 0.0.40
codegen_flags: <defaults>
</compile_context>

<pallas_src>
import jax
import jax.numpy as jnp
from jax.experimental import pallas as pl
from jax.experimental.pallas import tpu as pltpu

# ----------------------------- static config --------------------------------
FEAT = 513          # spectrogram feature bins (Conv1d in_channels / fc in_features)
B = 2               # batch
T = 128             # time frames
R = B * T           # total (b, t) rows
TR = 128            # (b, t) rows processed per grid step
LN_EPS = 1e-5


# ------------------------------- the kernel ---------------------------------
def deep_gated_nn_kernel(x_ref, p_ref, b_ref, out_ref):
    # x_ref  : (TR, FEAT) f32 VMEM  -- rows = (b, t) pairs, lanes = 513 features
    # p_ref  : (4,  FEAT) f32 VMEM  -- rows: [w_gate, ln_gamma, ln_beta, w_fc]
    # b_ref  : (2,)       f32 SMEM  -- [b_gate, b_fc]
    # out_ref: (TR, 1)    f32 VMEM
    x = x_ref[...]                                  # (TR, FEAT)
    w_gate = p_ref[0:1, :]                          # (1, FEAT)
    gamma = p_ref[1:2, :]
    beta = p_ref[2:3, :]
    w_fc = p_ref[3:4, :]

    inv_f = jnp.float32(1.0 / FEAT)

    # gate: Conv1d(513 -> 1, kernel_size=1) == per-(b,t) dot over features.
    g = jax.nn.sigmoid(
        jnp.sum(x * w_gate, axis=-1, keepdims=True) + b_ref[0])       # (TR, 1)

    # GatedTSNorm -- one-pass LayerNorm statistics over the feature (lane) axis.
    s1 = jnp.sum(x, axis=-1, keepdims=True)                           # sum(x)
    s2 = jnp.sum(x * x, axis=-1, keepdims=True)                       # sum(x^2)
    mu = s1 * inv_f
    var = s2 * inv_f - mu * mu
    xn = (x - mu) * jax.lax.rsqrt(var + LN_EPS)
    # TODO(synk): GatedTSNorm semantics assumed (module body not provided):
    #   gated affine LayerNorm over the 513 features per (b, t).
    y = g * (gamma * xn + beta)                                       # (TR, FEAT)

    # fc: Linear(513 -> 1) per (b, t) row, then sigmoid.
    z = jnp.sum(y * w_fc, axis=-1, keepdims=True) + b_ref[1]          # (TR, 1)
    out_ref[...] = jax.nn.sigmoid(z)


# ---------------------------- parameter building ----------------------------
def build_params(key):
    ks = jax.random.split(key, 6)
    w_gate = 0.1 * jax.random.normal(ks[0], (FEAT,), jnp.float32)     # gate.weight
    b_gate = 0.1 * jax.random.normal(ks[1], (), jnp.float32)          # gate.bias
    gamma = 1.0 + 0.1 * jax.random.normal(ks[2], (FEAT,), jnp.float32)  # norm weight
    beta = 0.1 * jax.random.normal(ks[3], (FEAT,), jnp.float32)       # norm bias
    w_fc = 0.1 * jax.random.normal(ks[4], (FEAT,), jnp.float32)       # fc.weight
    b_fc = 0.1 * jax.random.normal(ks[5], (), jnp.float32)            # fc.bias

    p_pack = jnp.stack([w_gate, gamma, beta, w_fc], axis=0)           # (4, FEAT)
    biases = jnp.stack([b_gate, b_fc])                                # (2,)
    return p_pack, biases


# -------------------------------- wrapper ------------------------------------
def deep_gated_nn_forward(x, params):
    # x: (B, 513, T), same layout the PyTorch Conv1d expects.
    if jnp.iscomplexobj(x):          # matches `if torch.is_complex(x): x = x.abs()`
        x = jnp.abs(x)
    Bx, Fx, Tx = x.shape
    assert Fx == FEAT
    rows = Bx * Tx
    assert rows % TR == 0, (rows, TR)

    # Lane-dense layout: (b, t) rows on sublanes, 513 features on lanes.
    x2 = jnp.transpose(x, (0, 2, 1)).reshape(rows, FEAT).astype(jnp.float32)
    p_pack, biases = params

    out = pl.pallas_call(
        deep_gated_nn_kernel,
        out_shape=jax.ShapeDtypeStruct((rows, 1), jnp.float32),
        grid_spec=pltpu.PrefetchScalarGridSpec(
            num_scalar_prefetch=0,
            grid=(rows // TR,),
            in_specs=[
                pl.BlockSpec((TR, FEAT), lambda i: (i, 0)),          # activations
                pl.BlockSpec((4, FEAT), lambda i: (0, 0)),           # packed params
                pl.BlockSpec(memory_space=pltpu.MemorySpace.SMEM),   # scalar biases
            ],
            out_specs=pl.BlockSpec((TR, 1), lambda i: (i, 0)),
        ),
        compiler_params=pltpu.CompilerParams(
            dimension_semantics=("parallel",)),
        cost_estimate=pl.CostEstimate(
            flops=12 * rows * FEAT,
            transcendentals=3 * rows,
            bytes_accessed=4 * (rows * FEAT + 4 * FEAT + 2 + rows)),
    )(x2, p_pack, biases)

    return out.reshape(Bx, Tx)       # matches DeepGatedNN.forward output (B, T)


# --------------------------------- main --------------------------------------
if __name__ == "__main__":
    key = jax.random.PRNGKey(0)
    k_param, k_x = jax.random.split(key)
    params = build_params(k_param)
    x = jax.random.normal(k_x, (B, FEAT, T), dtype=jnp.float32)

    y = jax.jit(deep_gated_nn_forward)(x, params)
    y = jax.block_until_ready(y)

    assert y.shape == (B, T), y.shape
    assert bool(jnp.all(jnp.isfinite(y)))
    assert bool(jnp.all((y > 0.0) & (y < 1.0)))   # sigmoid output
    print("KERNEL_OK")
</pallas_src>

<mosaic_0001>
module attributes {stable_mosaic.version = 11 : i64} {
  func.func @deep_gated_nn_kernel(%arg0: i32, %arg1: memref<128x513xf32, #tpu.memory_space<vmem>>, %arg2: memref<4x513xf32, #tpu.memory_space<vmem>>, %arg3: memref<2xf32, #tpu.memory_space<smem>>, %arg4: memref<128x1xf32, #tpu.memory_space<vmem>>) attributes {dimension_semantics = [#tpu.dimension_semantics<parallel>], iteration_bounds = array<i64: 2>, scalar_prefetch = 0 : i64, scratch_operands = 0 : i64, tpu.core_type = #tpu.core_type<tc>, window_params = [{transform_indices = @transform_0, window_bounds = array<i64: 128, 513>}, {pipeline_mode = #tpu.pipeline_mode<synchronous>, transform_indices = @transform_1, window_bounds = array<i64: 4, 513>}, {transform_indices = @transform_2, window_bounds = array<i64: 2>}, {transform_indices = @transform_3, window_bounds = array<i64: 128, 1>}]} {
    %c0 = arith.constant 0 : index
    %c0_0 = arith.constant 0 : index
    %0 = vector.load %arg1[%c0, %c0_0] : memref<128x513xf32, #tpu.memory_space<vmem>>, vector<128x513xf32>
    %c0_1 = arith.constant 0 : index
    %c0_2 = arith.constant 0 : index
    %1 = vector.load %arg2[%c0_1, %c0_2] : memref<4x513xf32, #tpu.memory_space<vmem>>, vector<1x513xf32>
    %c1 = arith.constant 1 : index
    %c0_3 = arith.constant 0 : index
    %2 = vector.load %arg2[%c1, %c0_3] : memref<4x513xf32, #tpu.memory_space<vmem>>, vector<1x513xf32>
    %c2 = arith.constant 2 : index
    %c0_4 = arith.constant 0 : index
    %3 = vector.load %arg2[%c2, %c0_4] : memref<4x513xf32, #tpu.memory_space<vmem>>, vector<1x513xf32>
    %c3 = arith.constant 3 : index
    %c0_5 = arith.constant 0 : index
    %4 = vector.load %arg2[%c3, %c0_5] : memref<4x513xf32, #tpu.memory_space<vmem>>, vector<1x513xf32>
    %5 = vector.broadcast %1 : vector<1x513xf32> to vector<128x513xf32>
    %6 = arith.mulf %0, %5 : vector<128x513xf32>
    %cst = arith.constant dense<0.000000e+00> : vector<128xf32>
    %7 = vector.multi_reduction <add>, %6, %cst [1] : vector<128x513xf32> to vector<128xf32>
    %8 = vector.shape_cast %7 : vector<128xf32> to vector<128x1xf32>
    %c0_6 = arith.constant 0 : index
    %9 = memref.load %arg3[%c0_6] : memref<2xf32, #tpu.memory_space<smem>>
    %10 = vector.broadcast %9 : f32 to vector<128x1xf32>
    %11 = arith.addf %8, %10 : vector<128x1xf32>
    %12 = arith.negf %11 : vector<128x1xf32>
    %13 = math.exp %12 : vector<128x1xf32>
    %cst_7 = arith.constant 1.000000e+00 : f32
    %14 = vector.broadcast %cst_7 : f32 to vector<128x1xf32>
    %15 = arith.addf %14, %13 : vector<128x1xf32>
    %16 = arith.divf %14, %15 : vector<128x1xf32>
    %cst_8 = arith.constant dense<0.000000e+00> : vector<128xf32>
    %17 = vector.multi_reduction <add>, %0, %cst_8 [1] : vector<128x513xf32> to vector<128xf32>
    %18 = vector.shape_cast %17 : vector<128xf32> to vector<128x1xf32>
    %19 = arith.mulf %0, %0 : vector<128x513xf32>
    %cst_9 = arith.constant dense<0.000000e+00> : vector<128xf32>
    %20 = vector.multi_reduction <add>, %19, %cst_9 [1] : vector<128x513xf32> to vector<128xf32>
    %21 = vector.shape_cast %20 : vector<128xf32> to vector<128x1xf32>
    %cst_10 = arith.constant 0.00194931775 : f32
    %22 = vector.broadcast %cst_10 : f32 to vector<128x1xf32>
    %23 = arith.mulf %18, %22 : vector<128x1xf32>
    %cst_11 = arith.constant 0.00194931775 : f32
    %24 = vector.broadcast %cst_11 : f32 to vector<128x1xf32>
    %25 = arith.mulf %21, %24 : vector<128x1xf32>
    %26 = arith.mulf %23, %23 : vector<128x1xf32>
    %27 = arith.subf %25, %26 : vector<128x1xf32>
    %28 = vector.broadcast %23 : vector<128x1xf32> to vector<128x513xf32>
    %29 = arith.subf %0, %28 : vector<128x513xf32>
    %cst_12 = arith.constant 9.99999974E-6 : f32
    %30 = vector.broadcast %cst_12 : f32 to vector<128x1xf32>
    %31 = arith.addf %27, %30 : vector<128x1xf32>
    %32 = math.rsqrt %31 : vector<128x1xf32>
    %33 = vector.broadcast %32 : vector<128x1xf32> to vector<128x513xf32>
    %34 = arith.mulf %29, %33 : vector<128x513xf32>
    %35 = vector.broadcast %2 : vector<1x513xf32> to vector<128x513xf32>
    %36 = arith.mulf %35, %34 : vector<128x513xf32>
    %37 = vector.broadcast %3 : vector<1x513xf32> to vector<128x513xf32>
    %38 = arith.addf %36, %37 : vector<128x513xf32>
    %39 = vector.broadcast %16 : vector<128x1xf32> to vector<128x513xf32>
    %40 = arith.mulf %39, %38 : vector<128x513xf32>
    %41 = vector.broadcast %4 : vector<1x513xf32> to vector<128x513xf32>
    %42 = arith.mulf %40, %41 : vector<128x513xf32>
    %cst_13 = arith.constant dense<0.000000e+00> : vector<128xf32>
    %43 = vector.multi_reduction <add>, %42, %cst_13 [1] : vector<128x513xf32> to vector<128xf32>
    %44 = vector.shape_cast %43 : vector<128xf32> to vector<128x1xf32>
    %c1_14 = arith.constant 1 : index
    %45 = memref.load %arg3[%c1_14] : memref<2xf32, #tpu.memory_space<smem>>
    %46 = vector.broadcast %45 : f32 to vector<128x1xf32>
    %47 = arith.addf %44, %46 : vector<128x1xf32>
    %48 = arith.negf %47 : vector<128x1xf32>
    %49 = math.exp %48 : vector<128x1xf32>
    %cst_15 = arith.constant 1.000000e+00 : f32
    %50 = vector.broadcast %cst_15 : f32 to vector<128x1xf32>
    %51 = arith.addf %50, %49 : vector<128x1xf32>
    %52 = arith.divf %50, %51 : vector<128x1xf32>
    %c0_16 = arith.constant 0 : index
    %c0_17 = arith.constant 0 : index
    %53 = vector.load %arg4[%c0_16, %c0_17] : memref<128x1xf32, #tpu.memory_space<vmem>>, vector<128x1xf32>
    tpu.vector_store %arg4[%c0_16, %c0_17], %52 {strides = array<i32>} : memref<128x1xf32, #tpu.memory_space<vmem>>, vector<128x1xf32>,
    return
  }
  func.func @transform_0(%arg0: i32) -> (i32, i32) {
    %c0_i32 = arith.constant 0 : i32
    %c0_i32_0 = arith.constant 0 : i32
    return %arg0, %c0_i32 : i32, i32
  }
  func.func @transform_1(%arg0: i32) -> (i32, i32) {
    %c0_i32 = arith.constant 0 : i32
    %c0_i32_0 = arith.constant 0 : i32
    %c0_i32_1 = arith.constant 0 : i32
    return %c0_i32, %c0_i32_0 : i32, i32
  }
  func.func @transform_2(%arg0: i32) -> i32 {
    %c0_i32 = arith.constant 0 : i32
    %c0_i32_0 = arith.constant 0 : i32
    return %c0_i32 : i32
  }
  func.func @transform_3(%arg0: i32) -> (i32, i32) {
    %c0_i32 = arith.constant 0 : i32
    %c0_i32_0 = arith.constant 0 : i32
    return %arg0, %c0_i32 : i32, i32
  }
}

</mosaic_0001>

<bundles_post_ra>
// kernel: deep_gated_nn_forward.1
= control target key start
LH: loop header
LB: loop body
LE: loop exit
PB: predicated region body
PF: predicated region fallthrough
CT: control target
= control target key end

     0   :  { %8 = vsyncpa [#allocation3], 0  ;;  %s2236_s12 = smov 0   ;;  %s4340_s0 = inlined_call_operand.vmem [shape: f32[256,513], index: 0, kind: input, shape index: {}]   ;;  %s4341_s1 = inlined_call_operand.vmem [shape: f32[4,513], index: 1, kind: input, shape index: {}]   ;;  %s4342_s2 = inlined_call_operand.vmem [shape: f32[2], index: 2, kind: input, shape index: {}]   ;;  %s4343_s3 = inlined_call_operand.vmem [shape: f32[256,1], index: 3, kind: output, shape index: {}]  }
   0x1 LB: > { %s1879_s13 = sadd.s32 4294967295, %s2213_s12   ;;  %p1881_p0 = scmp.ge.s32.totalorder %s2213_s12, 1  ;;  %s2213_s12 = sphi %s2236_s12, %s14_s12  }
   0x2   : > { %p113_p1 = scmp.lt.s32.totalorder %s2213_s12, 3  ;;  %s129_s16 = sshll.u32 %s4342_s2, 4  ;;  %s130_s16 = int_to_ptr.vmem [resolvable:$true] %s129_s16 }
   0x3   : > { %p2251_p3 = scmp.eq.s32.totalorder %s1879_s13, 0  ;;  %s2188_s19 = scalar_lea.vmem %s130_s16, 16 }
   0x4   : > { %p2247_p2 = pnand %p1881_p0, %p113_p1  ;;  %p2189_p6 = scmp.ne.s32.totalorder %s130_s16, %s2188_s19 }
   0x5   : > { %p2196_p10 = scmp.lt.s32.totalorder %s130_s16, %s130_s16  ;;  %p2197_p11 = scmp.lt.s32.totalorder %s2188_s19, %s2188_s19 }
   0x6   : > { %p1933_p4 = pneg %p2247_p2 }
   0x7   : > { %p2198_p12 = por %p2197_p11, %p2196_p10 }
   0x8   : > { %p1934_p5 = pnand %p2251_p3, %p1933_p4 }
   0xa   : > { %p2190_p7 = pneg %p1934_p5 }
   0xc   : > { %p2191_p8 = pnand %p2190_p7, %p2189_p6 }
   0xe   : > { %p2192_p9 = pneg %p2191_p8 }
  0x10   : > { %p2199_p13 = pnand %p2198_p12, %p2192_p9 }
  0x12   : > { %2202 = shalt.err (!%p2199_p13)
}
  0x13   : > { %s2215_s20 = smov [#allocation2]   ;;  %152 = sbr.rel (%p2247_p2) target bundleno = 604 (0x25c), region = 32 }
  0x14   : > { %1936 = dma.vmem_to_smem (!%p1934_p5), %s130_s16, 16, %s2215_s20, [#allocation3]  }
  0x18   : > { %2208 = dma.done.wait (%p2251_p3), [#allocation3], 16  }
  0x19   : > { %2210 = vsyncadd (%p2251_p3), [#allocation3], 4294967280 }
  0x1a   : > { %158 = sfence }
  0x1b   : > { %s1886_s21 = sshll.u32 %s1879_s13, 4  ;;  %v279_v0 = vlaneseq  ;;  %v271_v2 = vld [vmem:[%s4341_s1] ss:$4 sm:$0x1f]  ;;  %vm387_vm0 = vcmask 7168   ;;  %s497_s28 = sld [smem:[#allocation2]] }
  0x1c   : > { %p179_p0 = scmp.lt.s32.totalorder %s1886_s21, 31  ;;  %s1909_s8 = sld [smem:[#allocation2 + $0x1]] }
  0x1d   : > { %v280_v1 = vshrl.u32 %v279_v0, 7 }
  0x1e   : > { %s4935_s21 = smov (!%p179_p0, %s1886_s21), 31 }
  0x1f   : > { %v2270_v3 = vsub.s32 0, %v280_v1  ;;  %v2272_v4 = vsub.s32 1, %v280_v1  ;;  %v2274_v5 = vsub.s32 2, %v280_v1  ;;  %v2276_v6 = vsub.s32 3, %v280_v1  ;;  %s1928_s24 = smul.u32 40, %s4935_s21  ;;  %s1889_s9 = sshll.u32 %s4935_s21, 3 }
  0x20   : > { %v2279_v7 = vsub.s32 4, %v280_v1  ;;  %s4291_s13 = scalar_lea.vmem %s4343_s3, %s1889_s9 }
  0x21   : > { %4542 = vst [vmem:[#allocation5_spill] sm:$0xff] %v2270_v3  ;;  %4543 = vst [vmem:[#allocation6_spill] sm:$0xff] %v2272_v4  ;;  %v2282_v8 = vrot.slane %v271_v2, %v2270_v3  ;;  %v2285_v9 = vrot.slane %v271_v2, %v2272_v4  ;;  %v2288_v10 = vrot.slane %v271_v2, %v2274_v5  ;;  %s2296_s27 = scalar_lea.vmem %s4340_s0, %s1928_s24 }
  0x22   : > { %4544 = vst [vmem:[#allocation7_spill] sm:$0xff] %v2274_v5  ;;  %4545 = vst [vmem:[#allocation8_spill] sm:$0xff] %v2276_v6  ;;  %v2291_v11 = vrot.slane %v271_v2, %v2276_v6  ;;  %v2299_v12 = vrot.slane %v271_v2, %v2279_v7  ;;  %v2302_v13 = vld [vmem:[%s2296_s27 + $0x50] sm:$0xff]  ;;  %v2305_v14 = vld [vmem:[%s2296_s27 + $0x58] sm:$0xff] }
  0x23   : > { %4546 = vst [vmem:[#allocation9_spill] sm:$0xff] %v2279_v7  ;;  %v2308_v15 = vld [vmem:[%s2296_s27 + $0x60] sm:$0xff]  ;;  %v2311_v16 = vld [vmem:[%s2296_s27 + $0x68] sm:$0xff]  ;;  %v2314_v17 = vld [vmem:[%s2296_s27 + $0x70] sm:$0xff]  ;;  %v314_v18 = vmul.f32 %v2282_v8, %v2302_v13  ;;  %v315_v19 = vmul.f32 %v2285_v9, %v2305_v14 }
  0x24   : > { %v316_v20 = vmul.f32 %v2288_v10, %v2308_v15  ;;  %v2323_v21 = vld [vmem:[%s2296_s27] sm:$0xff]  ;;  %v317_v22 = vmul.f32 %v2291_v11, %v2311_v16  ;;  %v318_v23 = vmul.f32 %v2299_v12, %v2314_v17  ;;  %v2330_v24 = vld [vmem:[%s2296_s27 + $0x8] sm:$0xff]  ;;  %v2333_v25 = vld [vmem:[%s2296_s27 + $0x10] sm:$0xff] }
  0x25   : > { %v2336_v26 = vld [vmem:[%s2296_s27 + $0x18] sm:$0xff]  ;;  %v304_v27 = vmul.f32 %v2282_v8, %v2323_v21  ;;  %v399_v28 = vadd.f32 %v315_v19, %v314_v18  ;;  %v2341_v29 = vld [vmem:[%s2296_s27 + $0x20] sm:$0xff]  ;;  %v305_v30 = vmul.f32 %v2285_v9, %v2330_v24  ;;  %v306_v31 = vmul.f32 %v2288_v10, %v2333_v25  ;;  %v2359_v37 = vld [vmem:[%s2296_s27 + $0x88] sm:$0xff] }
  0x26   : > { %v307_v32 = vmul.f32 %v2291_v11, %v2336_v26  ;;  %v2350_v33 = vld [vmem:[%s2296_s27 + $0x78] sm:$0xff]  ;;  %v2353_v34 = vld [vmem:[%s2296_s27 + $0x80] sm:$0xff]  ;;  %v402_v35 = vsel %vm387_vm0, %v318_v23, 0.0  ;;  %v308_v36 = vmul.f32 %v2299_v12, %v2341_v29  ;;  %v2362_v38 = vld [vmem:[%s2296_s27 + $0x90] sm:$0xff]  ;;  %v321_v44 = vmul.f32 %v2288_v10, %v2359_v37 }
  0x27   : > { %v2365_v39 = vld [vmem:[%s2296_s27 + $0x98] sm:$0xff]  ;;  %v319_v40 = vmul.f32 %v2282_v8, %v2350_v33  ;;  %v320_v41 = vmul.f32 %v2285_v9, %v2353_v34  ;;  %v400_v42 = vadd.f32 %v399_v28, %v316_v20  ;;  %v384_v43 = vadd.f32 %v305_v30, %v304_v27  ;;  %v2376_v46 = vld [vmem:[%s2296_s27 + $0x28] sm:$0xff]  ;;  %v2379_v47 = vld [vmem:[%s2296_s27 + $0x30] sm:$0xff] }
  0x28   : > { %v322_v45 = vmul.f32 %v2291_v11, %v2362_v38  ;;  %v2382_v48 = vld [vmem:[%s2296_s27 + $0x38] sm:$0xff]  ;;  %v388_v49 = vsel %vm387_vm0, %v308_v36, 0.0  ;;  %v323_v50 = vmul.f32 %v2299_v12, %v2365_v39  ;;  %v2388_v52 = vld [vmem:[%s2296_s27 + $0x40] sm:$0xff]  ;;  %v2391_v53 = vld [vmem:[%s2296_s27 + $0x48] sm:$0xff]  ;;  %v309_v54 = vmul.f32 %v2282_v8, %v2376_v46 }
  0x29   : > { %v406_v51 = vadd.f32 %v320_v41, %v319_v40  ;;  %v2396_v55 = vld [vmem:[%s2296_s27 + $0xc8] sm:$0xff]  ;;  %v401_v56 = vadd.f32 %v400_v42, %v317_v22  ;;  %v385_v57 = vadd.f32 %v384_v43, %v306_v31  ;;  %v310_v58 = vmul.f32 %v2285_v9, %v2379_v47  ;;  %v2403_v60 = vld [vmem:[%s2296_s27 + $0xd0] sm:$0xff]  ;;  %v2406_v61 = vld [vmem:[%s2296_s27 + $0xd8] sm:$0xff] }
  0x2a   : > { %v311_v59 = vmul.f32 %v2288_v10, %v2382_v48  ;;  %v409_v63 = vsel %vm387_vm0, %v323_v50, 0.0  ;;  %v312_v0 = vmul.f32 %v2291_v11, %v2388_v52  ;;  %v313_v1 = vmul.f32 %v2299_v12, %v2391_v53  ;;  %v2414_v2 = vld [vmem:[%s2296_s27 + $0xe0] sm:$0xff]  ;;  %v2417_v18 = vld [vmem:[%s2296_s27 + $0xe8] sm:$0xff]  ;;  %v2436_v40 = vld [vmem:[%s2296_s27 + $0xb8] sm:$0xff] }
  0x2b   : > { %v407_v62 = vadd.f32 %v406_v51, %v321_v44  ;;  %4547 = vst [vmem:[#allocation10_spill] sm:$0xff] %v2414_v2  ;;  %4548 = vst [vmem:[#allocation11_spill] sm:$0xff] %v2417_v18  ;;  %v403_v19 = vadd.f32 %v402_v35, %v401_v56  ;;  %v386_v20 = vadd.f32 %v385_v57, %v307_v32  ;;  %v2422_v27 = vld [vmem:[%s2296_s27 + $0xa0] sm:$0xff]  ;;  %v2425_v28 = vld [vmem:[%s2296_s27 + $0xa8] sm:$0xff] }
  0x2c   : > { %v392_v22 = vadd.f32 %v310_v58, %v309_v54  ;;  %v329_v23 = vmul.f32 %v2282_v8, %v2396_v55  ;;  %4549 = vst [vmem:[#allocation12_spill] sm:$0xff] %v2422_v27  ;;  %4550 = vst [vmem:[#allocation13_spill] sm:$0xff] %v2425_v28  ;;  %v395_v31 = vsel %vm387_vm0, %v313_v1, 0.0  ;;  %v330_v36 = vmul.f32 %v2285_v9, %v2403_v60  ;;  %v2433_v35 = vld [vmem:[%s2296_s27 + $0xb0] sm:$0xff]  ;;  %v2446_v50 = vld [vmem:[%s2296_s27 + $0x118] sm:$0xff] }
  0x2d   : > { %v408_v30 = vadd.f32 %v407_v62, %v322_v45  ;;  %v331_v32 = vmul.f32 %v2288_v10, %v2406_v61  ;;  %4551 = vst [vmem:[#allocation14_spill] sm:$0xff] %v2433_v35  ;;  %4552 = vst [vmem:[#allocation15_spill] sm:$0xff] %v2436_v40  ;;  %404 = vadd.xlane.f32.xlu1 %v403_v19  ;;  %v389_v41 = vadd.f32 %v388_v49, %v386_v20  ;;  %v2443_v45 = vld [vmem:[%s2296_s27 + $0xc0] sm:$0xff]  ;;  %v2456_v58 = vld [vmem:[%s2296_s27 + $0x128] sm:$0xff] }
  0x2e   : > { %v393_v42 = vadd.f32 %v392_v22, %v311_v59  ;;  %v332_v43 = vmul.f32 %v2291_v11, %v2414_v2  ;;  %v333_v44 = vmul.f32 %v2299_v12, %v2417_v18  ;;  %4553 = vst [vmem:[#allocation16_spill] sm:$0xff] %v2443_v45  ;;  %4554 = vst [vmem:[#allocation17_spill] sm:$0xff] %v2446_v50  ;;  %v2453_v57 = vld [vmem:[%s2296_s27 + $0x120] sm:$0xff]  ;;  %v2459_v59 = vld [vmem:[%s2296_s27 + $0x130] sm:$0xff] }
  0x2f   : > { %v410_v51 = vadd.f32 %v409_v63, %v408_v30  ;;  %v420_v54 = vadd.f32 %v330_v36, %v329_v23  ;;  %v324_v56 = vmul.f32 %v2282_v8, %v2422_v27  ;;  %v325_v49 = vmul.f32 %v2285_v9, %v2425_v28  ;;  %4555 = vst [vmem:[#allocation18_spill] sm:$0xff] %v2453_v57  ;;  %v2467_v20 = vld [vmem:[%s2296_s27 + $0x138] sm:$0xff]  ;;  %v2474_v36 = vld [vmem:[%s2296_s27 + $0xf0] sm:$0xff] }
  0x30   : > { %4556 = vst [vmem:[#allocation19_spill] sm:$0xff] %v2456_v58  ;;  %4557 = vst [vmem:[#allocation20_spill] sm:$0xff] %v2459_v59  ;;  %390 = vadd.xlane.f32.xlu0 %v389_v41  ;;  %v394_v62 = vadd.f32 %v393_v42, %v312_v0  ;;  %v423_v63 = vsel %vm387_vm0, %v333_v44, 0.0  ;;  %v326_v1 = vmul.f32 %v2288_v10, %v2433_v35  ;;  %v2477_v41 = vld [vmem:[%s2296_s27 + $0xf8] sm:$0xff]  ;;  %v2480_v42 = vld [vmem:[%s2296_s27 + $0x100] sm:$0xff] }
  0x31   : > { %v327_v19 = vmul.f32 %v2291_v11, %v2436_v40  ;;  %4558 = vst [vmem:[#allocation21_spill] sm:$0xff] %v2467_v20  ;;  %v421_v22 = vadd.f32 %v420_v54, %v331_v32  ;;  %v328_v23 = vmul.f32 %v2299_v12, %v2443_v45  ;;  %v413_v30 = vadd.f32 %v325_v49, %v324_v56  ;;  %v2489_v49 = vld [vmem:[%s2296_s27 + $0x108] sm:$0xff] }
  0x32   : > { %v339_v0 = vmul.f32 %v2282_v8, %v2446_v50  ;;  %4559 = vst [vmem:[#allocation22_spill] sm:$0xff] %v2474_v36  ;;  %4560 = vst [vmem:[#allocation23_spill] sm:$0xff] %v2477_v41  ;;  %411 = vadd.xlane.f32.xlu1 %v410_v51  ;;  %v396_v44 = vadd.f32 %v395_v31, %v394_v62  ;;  %v340_v32 = vmul.f32 %v2285_v9, %v2453_v57  ;;  %v2495_v51 = vld [vmem:[%s2296_s27 + $0x110] sm:$0xff]  ;;  %v2498_v62 = vld [vmem:[%s2296_s27 + $0x168] sm:$0xff] }
  0x33   : > { %4561 = vst [vmem:[#allocation24_spill] sm:$0xff] %v2480_v42  ;;  %v341_v54 = vmul.f32 %v2288_v10, %v2456_v58  ;;  %v342_v56 = vmul.f32 %v2291_v11, %v2459_v59  ;;  %4562 = vst [vmem:[#allocation25_spill] sm:$0xff] %v2489_v49  ;;  %v422_v7 = vadd.f32 %v421_v22, %v332_v43  ;;  %v416_v5 = vsel %vm387_vm0, %v328_v23, 0.0  ;;  %v2507_v22 = vld [vmem:[%s2296_s27 + $0x170] sm:$0xff]  ;;  %v2510_v23 = vld [vmem:[%s2296_s27 + $0x178] sm:$0xff] }
  0x34   : > { %v414_v6 = vadd.f32 %v413_v30, %v326_v1  ;;  %v343_v31 = vmul.f32 %v2299_v12, %v2467_v20  ;;  %4563 = vst [vmem:[#allocation26_spill] sm:$0xff] %v2495_v51  ;;  %4564 = vst [vmem:[#allocation27_spill] sm:$0xff] %v2498_v62  ;;  %397 = vadd.xlane.f32.xlu0 %v396_v44  ;;  %v434_v4 = vadd.f32 %v340_v32, %v339_v0  ;;  %v2513_v30 = vld [vmem:[%s2296_s27 + $0x180] sm:$0xff]  ;;  %v2519_v20 = vld [vmem:[%s2296_s27 + $0x188] sm:$0xff] }
  0x35   : > { %v334_v3 = vmul.f32 %v2282_v8, %v2474_v36  ;;  %v335_v43 = vmul.f32 %v2285_v9, %v2477_v41  ;;  %v336_v1 = vmul.f32 %v2288_v10, %v2480_v42  ;;  %4565 = vst [vmem:[#allocation28_spill] sm:$0xff] %v2507_v22  ;;  %4566 = vst [vmem:[#allocation29_spill] sm:$0xff] %v2510_v23 }
  0x36   : > { %4567 = vst [vmem:[#allocation30_spill] sm:$0xff] %v2513_v30  ;;  %v424_v44 = vadd.f32 %v423_v63, %v422_v7  ;;  %v415_v0 = vadd.f32 %v414_v6, %v327_v19  ;;  %v437_v32 = vsel %vm387_vm0, %v343_v31, 0.0  ;;  %v337_v59 = vmul.f32 %v2291_v11, %v2489_v49  ;;  %4568 = vst [vmem:[#allocation31_spill] sm:$0xff] %v2519_v20  ;;  %v2526_v7 = vld [vmem:[%s2296_s27 + $0x140] sm:$0xff]  ;;  %v2529_v6 = vld [vmem:[%s2296_s27 + $0x148] sm:$0xff] }
  0x37   : > { %v435_v40 = vadd.f32 %v434_v4, %v341_v54  ;;  %v338_v42 = vmul.f32 %v2299_v12, %v2495_v51  ;;  %v427_v45 = vadd.f32 %v335_v43, %v334_v3  ;;  %v349_v58 = vmul.f32 %v2282_v8, %v2498_v62  ;;  %4569 = vst [vmem:[#allocation32_spill] sm:$0xff] %v2526_v7  ;;  %v2532_v63 = vld [vmem:[%s2296_s27 + $0x150] sm:$0xff]  ;;  %v2541_v31 = vld [vmem:[%s2296_s27 + $0x158] sm:$0xff] }
  0x38   : > { %4570 = vst [vmem:[#allocation33_spill] sm:$0xff] %v2529_v6  ;;  %4571 = vst [vmem:[#allocation34_spill] sm:$0xff] %v2532_v63  ;;  %425 = vadd.xlane.f32.xlu1 %v424_v44  ;;  %v417_v19 = vadd.f32 %v416_v5, %v415_v0  ;;  %v350_v4 = vmul.f32 %v2285_v9, %v2507_v22  ;;  %v351_v3 = vmul.f32 %v2288_v10, %v2510_v23  ;;  %v2547_v44 = vld [vmem:[%s2296_s27 + $0x160] sm:$0xff]  ;;  %v2550_v0 = vld [vmem:[%s2296_s27 + $0x1b8] sm:$0xff] }
  0x39   : > { %v352_v54 = vmul.f32 %v2291_v11, %v2513_v30  ;;  %4572 = vst [vmem:[#allocation35_spill] sm:$0xff] %v2541_v31  ;;  %v436_v43 = vadd.f32 %v435_v40, %v342_v56  ;;  %v428_v49 = vadd.f32 %v427_v45, %v336_v1  ;;  %v430_v51 = vsel %vm387_vm0, %v338_v42, 0.0  ;;  %4573 = vst [vmem:[#allocation36_spill] sm:$0xff] %v2547_v44  ;;  %v2559_v42 = vld [vmem:[%s2296_s27 + $0x1c0] sm:$0xff]  ;;  %v2562_v56 = vld [vmem:[%s2296_s27 + $0x1c8] sm:$0xff] }
  0x3a   : > { %v353_v5 = vmul.f32 %v2299_v12, %v2519_v20  ;;  %4574 = vst [vmem:[#allocation37_spill] sm:$0xff] %v2550_v0  ;;  %418 = vadd.xlane.f32.xlu0 %v417_v19  ;;  %v448_v23 = vadd.f32 %v350_v4, %v349_v58  ;;  %v344_v30 = vmul.f32 %v2282_v8, %v2526_v7  ;;  %4575 = vst [vmem:[#allocation38_spill] sm:$0xff] %v2559_v42  ;;  %v2565_v1 = vld [vmem:[%s2296_s27 + $0x1d0] sm:$0xff]  ;;  %v2571_v7 = vld [vmem:[%s2296_s27 + $0x1d8] sm:$0xff] }
  0x3b   : > { %v345_v40 = vmul.f32 %v2285_v9, %v2529_v6  ;;  %v346_v45 = vmul.f32 %v2288_v10, %v2532_v63  ;;  %4576 = vst [vmem:[#allocation39_spill] sm:$0xff] %v2562_v56  ;;  %4577 = vst [vmem:[#allocation40_spill] sm:$0xff] %v2565_v1  ;;  %v438_v19 = vadd.f32 %v437_v32, %v436_v43  ;;  %v2578_v32 = vld [vmem:[%s2296_s27 + $0x190] sm:$0xff] }
  0x3c   : > { %v429_v58 = vadd.f32 %v428_v49, %v337_v59  ;;  %v451_v4 = vsel %vm387_vm0, %v353_v5, 0.0  ;;  %v347_v20 = vmul.f32 %v2291_v11, %v2541_v31  ;;  %4578 = vst [vmem:[#allocation41_spill] sm:$0xff] %v2571_v7  ;;  %v449_v6 = vadd.f32 %v448_v23, %v351_v3  ;;  %4579 = vst [vmem:[#allocation42_spill] sm:$0xff] %v2578_v32  ;;  %v2581_v59 = vld [vmem:[%s2296_s27 + $0x198] sm:$0xff]  ;;  %v2584_v49 = vld [vmem:[%s2296_s27 + $0x1a0] sm:$0xff] }
  0x3d   : > { %v348_v63 = vmul.f32 %v2299_v12, %v2547_v44  ;;  %v441_v18 = vadd.f32 %v345_v40, %v344_v30  ;;  %v359_v22 = vmul.f32 %v2282_v8, %v2550_v0  ;;  %4580 = vst [vmem:[#allocation43_spill] sm:$0xff] %v2581_v59  ;;  %4581 = vst [vmem:[#allocation44_spill] sm:$0xff] %v2584_v49  ;;  %439 = vadd.xlane.f32.xlu1 %v438_v19  ;;  %v2593_v5 = vld [vmem:[%s2296_s27 + $0x1a8] sm:$0xff]  ;;  %v2599_v19 = vld [vmem:[%s2296_s27 + $0x1b0] sm:$0xff] }
  0x3e   : > { %v431_v43 = vadd.f32 %v430_v51, %v429_v58  ;;  %v360_v23 = vmul.f32 %v2285_v9, %v2559_v42  ;;  %v361_v30 = vmul.f32 %v2288_v10, %v2562_v56  ;;  %v362_v3 = vmul.f32 %v2291_v11, %v2565_v1  ;;  %4582 = vst [vmem:[#allocation45_spill] sm:$0xff] %v2593_v5  ;;  %v2602_v58 = vld [vmem:[%s2296_s27 + $0x208] sm:$0xff]  ;;  %v2682_v62 = vld [vmem:[%s2296_s27 + $0x230] sm:$0xff] }
  0x3f   : > { %v450_v40 = vadd.f32 %v449_v6, %v352_v54  ;;  %v442_v44 = vadd.f32 %v441_v18, %v346_v45  ;;  %v444_v31 = vsel %vm387_vm0, %v348_v63, 0.0  ;;  %v363_v51 = vmul.f32 %v2299_v12, %v2571_v7  ;;  %4583 = vst [vmem:[#allocation46_spill] sm:$0xff] %v2599_v19  ;;  %4584 = vst [vmem:[#allocation47_spill] sm:$0xff] %v2602_v58  ;;  %v2611_v63 = vld [vmem:[%s2296_s27 + $0x210] sm:$0xff]  ;;  %v2614_v54 = vld [vmem:[%s2296_s27 + $0x218] sm:$0xff] }
  0x40   : > { %432 = vadd.xlane.f32.xlu0 %v431_v43  ;;  %v462_v56 = vadd.f32 %v360_v23, %v359_v22  ;;  %v354_v1 = vmul.f32 %v2282_v8, %v2578_v32  ;;  %v355_v18 = vmul.f32 %v2285_v9, %v2581_v59  ;;  %v356_v6 = vmul.f32 %v2288_v10, %v2584_v49  ;;  %v2617_v45 = vld [vmem:[%s2296_s27 + $0x220] sm:$0xff]  ;;  %v2623_v32 = vld [vmem:[%s2296_s27 + $0x228] sm:$0xff] }
  0x41   : > { %4585 = vst [vmem:[#allocation48_spill] sm:$0xff] %v2611_v63  ;;  %4586 = vst [vmem:[#allocation49_spill] sm:$0xff] %v2614_v54  ;;  %v452_v43 = vadd.f32 %v451_v4, %v450_v40  ;;  %v443_v22 = vadd.f32 %v442_v44, %v347_v20  ;;  %v465_v23 = vsel %vm387_vm0, %v363_v51, 0.0  ;;  %v357_v7 = vmul.f32 %v2291_v11, %v2593_v5  ;;  %v2630_v4 = vld [vmem:[%s2296_s27 + $0x1e0] sm:$0xff]  ;;  %v2633_v20 = vld [vmem:[%s2296_s27 + $0x1e8] sm:$0xff] }
  0x42   : > { %4587 = vst [vmem:[#allocation50_spill] sm:$0xff] %v2617_v45  ;;  %4588 = vst [vmem:[#allocation51_spill] sm:$0xff] %v2623_v32  ;;  %v463_v59 = vadd.f32 %v462_v56, %v361_v30  ;;  %v358_v49 = vmul.f32 %v2299_v12, %v2599_v19  ;;  %v455_v42 = vadd.f32 %v355_v18, %v354_v1  ;;  %v2636_v44 = vld [vmem:[%s2296_s27 + $0x1f0] sm:$0xff]  ;;  %v2645_v51 = vld [vmem:[%s2296_s27 + $0x1f8] sm:$0xff] }
  0x43   : > { %v369_v0 = vmul.f32 %v2282_v8, %v2602_v58  ;;  %4589 = vst [vmem:[#allocation52_spill] sm:$0xff] %v2630_v4  ;;  %4590 = vst [vmem:[#allocation53_spill] sm:$0xff] %v2633_v20  ;;  %453 = vadd.xlane.f32.xlu1 %v452_v43  ;;  %v445_v40 = vadd.f32 %v444_v31, %v443_v22  ;;  %v370_v56 = vmul.f32 %v2285_v9, %v2611_v63  ;;  %v2651_v43 = vld [vmem:[%s2296_s27 + $0x200] sm:$0xff]  ;;  %v2654_v22 = vld [vmem:[%s2296_s27 + $0x258] sm:$0xff] }
  0x44   : > { %4591 = vst [vmem:[#allocation54_spill] sm:$0xff] %v2636_v44  ;;  %v371_v1 = vmul.f32 %v2288_v10, %v2614_v54  ;;  %v372_v30 = vmul.f32 %v2291_v11, %v2617_v45  ;;  %4592 = vst [vmem:[#allocation55_spill] sm:$0xff] %v2645_v51  ;;  %v464_v18 = vadd.f32 %v463_v59, %v362_v3  ;;  %v458_v19 = vsel %vm387_vm0, %v358_v49, 0.0  ;;  %v2663_v49 = vld [vmem:[%s2296_s27 + $0x260] sm:$0xff]  ;;  %v2666_v3 = vld [vmem:[%s2296_s27 + $0x268] sm:$0xff] }
  0x45   : > { %v456_v5 = vadd.f32 %v455_v42, %v356_v6  ;;  %v373_v31 = vmul.f32 %v2299_v12, %v2623_v32  ;;  %4593 = vst [vmem:[#allocation56_spill] sm:$0xff] %v2651_v43  ;;  %446 = vadd.xlane.f32.xlu0 %v445_v40  ;;  %v476_v54 = vadd.f32 %v370_v56, %v369_v0  ;;  %4594 = vst [vmem:[#allocation57_spill] sm:$0xff] %v2663_v49  ;;  %v2669_v6 = vld [vmem:[%s2296_s27 + $0x270] sm:$0xff] }
  0x46   : > { %v364_v45 = vmul.f32 %v2282_v8, %v2630_v4  ;;  %v365_v42 = vmul.f32 %v2285_v9, %v2633_v20  ;;  %v366_v59 = vmul.f32 %v2288_v10, %v2636_v44  ;;  %4595 = vst [vmem:[#allocation58_spill] sm:$0xff] %v2666_v3  ;;  %4596 = vst [vmem:[#allocation59_spill] sm:$0xff] %v2669_v6  ;;  %v2675_v4 = vld [vmem:[%s2296_s27 + $0x278] sm:$0xff] }
  0x47   : > { %v466_v40 = vadd.f32 %v465_v23, %v464_v18  ;;  %v457_v0 = vadd.f32 %v456_v5, %v357_v7  ;;  %v479_v56 = vsel %vm387_vm0, %v373_v31, 0.0  ;;  %v367_v32 = vmul.f32 %v2291_v11, %v2645_v51  ;;  %v2685_v7 = vld [vmem:[%s2296_s27 + $0x238] sm:$0xff]  ;;  %v2688_v5 = vld [vmem:[%s2296_s27 + $0x240] sm:$0xff] }
  0x48   : > { %v477_v20 = vadd.f32 %v476_v54, %v371_v1  ;;  %v368_v44 = vmul.f32 %v2299_v12, %v2651_v43  ;;  %v469_v63 = vadd.f32 %v365_v42, %v364_v45  ;;  %v379_v58 = vmul.f32 %v2282_v8, %v2654_v22  ;;  %v2697_v1 = vld [vmem:[%s2296_s27 + $0x248] sm:$0xff] }
  0x49   : > { %467 = vadd.xlane.f32.xlu1 %v466_v40  ;;  %v459_v23 = vadd.f32 %v458_v19, %v457_v0  ;;  %v380_v18 = vmul.f32 %v2285_v9, %v2663_v49  ;;  %v381_v54 = vmul.f32 %v2288_v10, %v2666_v3  ;;  %v382_v45 = vmul.f32 %v2291_v11, %v2669_v6  ;;  %v2703_v40 = vld [vmem:[%s2296_s27 + $0x250] sm:$0xff] }
  0x4a   : > { %v478_v31 = vadd.f32 %v477_v20, %v372_v30  ;;  %v470_v42 = vadd.f32 %v469_v63, %v366_v59  ;;  %v472_v43 = vsel %vm387_vm0, %v368_v44, 0.0  ;;  %v383_v51 = vmul.f32 %v2299_v12, %v2675_v4 }
  0x4b   : > { %460 = vadd.xlane.f32.xlu0 %v459_v23  ;;  %v490_v19 = vadd.f32 %v380_v18, %v379_v58  ;;  %v374_v0 = vmul.f32 %v2282_v8, %v2682_v62  ;;  %v375_v3 = vmul.f32 %v2285_v9, %v2685_v7  ;;  %v376_v6 = vmul.f32 %v2288_v10, %v2688_v5 }
  0x4c   : > { %v480_v20 = vadd.f32 %v479_v56, %v478_v31  ;;  %v471_v63 = vadd.f32 %v470_v42, %v367_v32  ;;  %v377_v44 = vmul.f32 %v2291_v11, %v2697_v1  ;;  %v625_v30 = vadd.f32 %v2305_v14, %v2302_v13 }
  0x4d   : > { %v491_v59 = vadd.f32 %v490_v19, %v381_v54  ;;  %v378_v58 = vmul.f32 %v2299_v12, %v2703_v40  ;;  %v483_v23 = vadd.f32 %v375_v3, %v374_v0  ;;  %v618_v8 = vadd.f32 %v2379_v47, %v2376_v46 }
  0x4e   : > { %481 = vadd.xlane.f32.xlu1 %v480_v20  ;;  %v473_v9 = vadd.f32 %v472_v43, %v471_v63  ;;  %v493_v10 = vsel %vm387_vm0, %v383_v51, 0.0  ;;  %v611_v32 = vadd.f32 %v2330_v24, %v2323_v21  ;;  %v621_v54 = vsel %vm387_vm0, %v2391_v53, 0.0 }
  0x4f   : > { %v492_v56 = vadd.f32 %v491_v59, %v382_v45  ;;  %v484_v11 = vadd.f32 %v483_v23, %v376_v6  ;;  %v619_v18 = vadd.f32 %v618_v8, %v2382_v48  ;;  %v486_v12 = vsel %vm387_vm0, %v378_v58, 0.0 }
  0x50   : > { %474 = vadd.xlane.f32.xlu0 %v473_v9  ;;  %v612_v3 = vadd.f32 %v611_v32, %v2333_v25  ;;  %v632_v43 = vadd.f32 %v2353_v34, %v2350_v33  ;;  %v626_v51 = vadd.f32 %v625_v30, %v2308_v15  ;;  %v646_v6 = vadd.f32 %v2403_v60, %v2396_v55 }
  0x51   : > { %v494_v31 = vadd.f32 %v493_v10, %v492_v56  ;;  %v485_v42 = vadd.f32 %v484_v11, %v377_v44  ;;  %v620_v45 = vadd.f32 %v619_v18, %v2388_v52  ;;  %v614_v0 = vsel %vm387_vm0, %v2341_v29, 0.0 }
  0x52   : > { %v613_v19 = vadd.f32 %v612_v3, %v2336_v26  ;;  %v633_v20 = vadd.f32 %v632_v43, %v2359_v37  ;;  %v627_v63 = vadd.f32 %v626_v51, %v2311_v16  ;;  %v647_v30 = vadd.f32 %v646_v6, %v2406_v61 }
  0x53   : > { %495 = vadd.xlane.f32.xlu1 %v494_v31  ;;  %v487_v59 = vadd.f32 %v486_v12, %v485_v42  ;;  %v622_v58 = vadd.f32 %v621_v54, %v620_v45  ;;  %v639_v44 = vadd.f32 %v2425_v28, %v2422_v27  ;;  %v635_v8 = vsel %vm387_vm0, %v2365_v39, 0.0  ;;  %v4597_v54 = vld [vmem:[#allocation27_spill] sm:$0xff]  ;;  %v4598_v12 = vld [vmem:[#allocation28_spill] sm:$0xff] }
  0x54   : > { %v634_v23 = vadd.f32 %v633_v20, %v2362_v38  ;;  %v628_v9 = vsel %vm387_vm0, %v2314_v17, 0.0  ;;  %v615_v10 = vadd.f32 %v614_v0, %v613_v19  ;;  %v660_v56 = vadd.f32 %v2453_v57, %v2446_v50  ;;  %v4599_v31 = vld [vmem:[#allocation11_spill] sm:$0xff]  ;;  %v4601_v19 = vld [vmem:[#allocation16_spill] sm:$0xff] }
  0x55   : > { %488 = vadd.xlane.f32.xlu0 %v487_v59  ;;  %v640_v32 = vadd.f32 %v639_v44, %v2433_v35  ;;  %v648_v11 = vadd.f32 %v647_v30, %v2414_v2  ;;  %v653_v18 = vadd.f32 %v2477_v41, %v2474_v36  ;;  %v674_v3 = vadd.f32 %v4598_v12, %v4597_v54  ;;  %v4600_v45 = vld [vmem:[#allocation19_spill] sm:$0xff]  ;;  %v4602_v20 = vld [vmem:[#allocation24_spill] sm:$0xff]  ;;  %v4603_v30 = vld [vmem:[#allocation29_spill] sm:$0xff] }
  0x56   : > { %v636_v43 = vadd.f32 %v635_v8, %v634_v23  ;;  %v629_v51 = vadd.f32 %v628_v9, %v627_v63  ;;  %v649_v42 = vsel %vm387_vm0, %v4599_v31, 0.0  ;;  %v661_v6 = vadd.f32 %v660_v56, %v4600_v45  ;;  %v4604_v57 = vld [vmem:[#allocation32_spill] sm:$0xff]  ;;  %v4605_v41 = vld [vmem:[#allocation33_spill] sm:$0xff]  ;;  %v4606_v12 = vld [vmem:[#allocation15_spill] sm:$0xff] }
  0x57   : > { %623 = vadd.xlane.f32.xlu1 %v622_v58  ;;  %v642_v0 = vsel %vm387_vm0, %v4601_v19, 0.0  ;;  %v654_v59 = vadd.f32 %v653_v18, %v4602_v20  ;;  %v675_v44 = vadd.f32 %v674_v3, %v4603_v30  ;;  %v667_v36 = vadd.f32 %v4605_v41, %v4604_v57  ;;  %v4607_v23 = vld [vmem:[#allocation21_spill] sm:$0xff]  ;;  %v4608_v8 = vld [vmem:[#allocation26_spill] sm:$0xff]  ;;  %v4611_v50 = vld [vmem:[#allocation20_spill] sm:$0xff] }
  0x58   : > { %v641_v58 = vadd.f32 %v640_v32, %v4606_v12  ;;  %v663_v63 = vsel %vm387_vm0, %v4607_v23, 0.0  ;;  %v656_v9 = vsel %vm387_vm0, %v4608_v8, 0.0  ;;  %v4609_v56 = vld [vmem:[#allocation37_spill] sm:$0xff]  ;;  %v4610_v54 = vld [vmem:[#allocation38_spill] sm:$0xff]  ;;  %v650_v19 = vadd.f32 %v649_v42, %v648_v11  ;;  %v4614_v31 = vld [vmem:[#allocation43_spill] sm:$0xff] }
  0x59   : > { %616 = vadd.xlane.f32.xlu0 %v615_v10  ;;  %v688_v45 = vadd.f32 %v4610_v54, %v4609_v56  ;;  %v662_v18 = vadd.f32 %v661_v6, %v4611_v50  ;;  %v4612_v20 = vld [vmem:[#allocation34_spill] sm:$0xff]  ;;  %v4615_v10 = vld [vmem:[#allocation25_spill] sm:$0xff]  ;;  %v4617_v23 = vld [vmem:[#allocation39_spill] sm:$0xff] }
  0x5a   : > { %v668_v3 = vadd.f32 %v667_v36, %v4612_v20  ;;  %v4613_v30 = vld [vmem:[#allocation42_spill] sm:$0xff]  ;;  %v655_v32 = vadd.f32 %v654_v59, %v4615_v10  ;;  %v4618_v35 = vld [vmem:[#allocation47_spill] sm:$0xff]  ;;  %v4619_v8 = vld [vmem:[#allocation48_spill] sm:$0xff] }
  0x5b   : > { %v681_v41 = vadd.f32 %v4614_v31, %v4613_v30  ;;  %637 = vadd.xlane.f32.xlu1 %v636_v43  ;;  %v4616_v57 = vld [vmem:[#allocation30_spill] sm:$0xff]  ;;  %v689_v2 = vadd.f32 %v688_v45, %v4617_v23  ;;  %v702_v28 = vadd.f32 %v4619_v8, %v4618_v35  ;;  %v4620_v27 = vld [vmem:[#allocation31_spill] sm:$0xff]  ;;  %v4622_v54 = vld [vmem:[#allocation36_spill] sm:$0xff]  ;;  %v643_v43 = vadd.f32 %v642_v0, %v641_v58 }
  0x5c   : > { %v676_v12 = vadd.f32 %v675_v44, %v4616_v57  ;;  %v677_v11 = vsel %vm387_vm0, %v4620_v27, 0.0  ;;  %v4621_v42 = vld [vmem:[#allocation35_spill] sm:$0xff]  ;;  %v670_v36 = vsel %vm387_vm0, %v4622_v54, 0.0  ;;  %v4623_v56 = vld [vmem:[#allocation44_spill] sm:$0xff]  ;;  %v4624_v59 = vld [vmem:[#allocation41_spill] sm:$0xff]  ;;  %v664_v35 = vadd.f32 %v663_v63, %v662_v18 }
  0x5d   : > { %v669_v6 = vadd.f32 %v668_v3, %v4621_v42  ;;  %v682_v31 = vadd.f32 %v681_v41, %v4623_v56  ;;  %630 = vadd.xlane.f32.xlu0 %v629_v51  ;;  %v691_v44 = vsel %vm387_vm0, %v4624_v59, 0.0  ;;  %v4625_v30 = vld [vmem:[#allocation49_spill] sm:$0xff]  ;;  %v4626_v23 = vld [vmem:[#allocation52_spill] sm:$0xff]  ;;  %v4629_v10 = vld [vmem:[#allocation46_spill] sm:$0xff]  ;;  %v716_v54 = vadd.f32 %v2663_v49, %v2654_v22 }
  0x5e   : > { %v703_v45 = vadd.f32 %v702_v28, %v4625_v30  ;;  %v4627_v57 = vld [vmem:[#allocation53_spill] sm:$0xff]  ;;  %v4628_v20 = vld [vmem:[#allocation40_spill] sm:$0xff]  ;;  %v684_v3 = vsel %vm387_vm0, %v4629_v10, 0.0  ;;  %v657_v41 = vadd.f32 %v656_v9, %v655_v32  ;;  %v678_v51 = vadd.f32 %v677_v11, %v676_v12  ;;  %v4630_v0 = vld [vmem:[#allocation51_spill] sm:$0xff] }
  0x5f   : > { %v695_v8 = vadd.f32 %v4627_v57, %v4626_v23  ;;  %v690_v27 = vadd.f32 %v689_v2, %v4628_v20  ;;  %651 = vadd.xlane.f32.xlu1 %v650_v19  ;;  %v705_v58 = vsel %vm387_vm0, %v4630_v0, 0.0  ;;  %v4631_v59 = vld [vmem:[#allocation54_spill] sm:$0xff]  ;;  %v671_v30 = vadd.f32 %v670_v36, %v669_v6  ;;  %v4632_v56 = vld [vmem:[#allocation45_spill] sm:$0xff]  ;;  %v4635_v49 = vld [vmem:[#allocation55_spill] sm:$0xff] }
  0x60   : > { %v683_v57 = vadd.f32 %v682_v31, %v4632_v56  ;;  %v4633_v63 = vld [vmem:[#allocation58_spill] sm:$0xff]  ;;  %v709_v2 = vadd.f32 %v2685_v7, %v2682_v62  ;;  %v728_v12 = vmul.f32 %v2376_v46, %v2376_v46  ;;  %v729_v9 = vmul.f32 %v2379_v47, %v2379_v47  ;;  %v4636_v32 = vld [vmem:[#allocation56_spill] sm:$0xff]  ;;  %v4637_v6 = vld [vmem:[#allocation59_spill] sm:$0xff] }
  0x61   : > { %v696_v28 = vadd.f32 %v695_v8, %v4631_v59  ;;  %v717_v18 = vadd.f32 %v716_v54, %v4633_v63  ;;  %644 = vadd.xlane.f32.xlu0 %v643_v43  ;;  %v4634_v23 = vld [vmem:[#allocation50_spill] sm:$0xff]  ;;  %v692_v8 = vadd.f32 %v691_v44, %v690_v27  ;;  %v698_v31 = vsel %vm387_vm0, %v4636_v32, 0.0 }
  0x62   : > { %v704_v10 = vadd.f32 %v703_v45, %v4634_v23  ;;  %v719_v54 = vsel %vm387_vm0, %v2675_v4, 0.0  ;;  %v730_v11 = vmul.f32 %v2382_v48, %v2382_v48  ;;  %v710_v43 = vadd.f32 %v709_v2, %v2688_v5 }
  0x63   : > { %v697_v19 = vadd.f32 %v696_v28, %v4635_v49  ;;  %665 = vadd.xlane.f32.xlu1 %v664_v35  ;;  %v718_v36 = vadd.f32 %v717_v18, %v4637_v6  ;;  %v810_v45 = vadd.f32 %v729_v9, %v728_v12  ;;  %v723_v46 = vmul.f32 %v2323_v21, %v2323_v21 }
  0x64   : > { %v685_v47 = vadd.f32 %v684_v3, %v683_v57  ;;  %v712_v27 = vsel %vm387_vm0, %v2703_v40, 0.0  ;;  %v724_v44 = vmul.f32 %v2330_v24, %v2330_v24  ;;  %v725_v28 = vmul.f32 %v2333_v25, %v2333_v25 }
  0x65   : > { %658 = vadd.xlane.f32.xlu0 %v657_v41  ;;  %v706_v48 = vadd.f32 %v705_v58, %v704_v10  ;;  %v699_v35 = vadd.f32 %v698_v31, %v697_v19  ;;  %v731_v18 = vmul.f32 %v2388_v52, %v2388_v52  ;;  %v732_v2 = vmul.f32 %v2391_v53, %v2391_v53 }
  0x66   : > { %v811_v21 = vadd.f32 %v810_v45, %v730_v11  ;;  %v803_v57 = vadd.f32 %v724_v44, %v723_v46  ;;  %v738_v3 = vmul.f32 %v2350_v33, %v2350_v33  ;;  %v739_v24 = vmul.f32 %v2353_v34, %v2353_v34  ;;  %v4639_v46 = vld [vmem:[#allocation13_spill] sm:$0xff] }
  0x67   : > { %679 = vadd.xlane.f32.xlu1 %v678_v51  ;;  %v720_v12 = vadd.f32 %v719_v54, %v718_v36  ;;  %v711_v25 = vadd.f32 %v710_v43, %v2697_v1  ;;  %v726_v10 = vmul.f32 %v2336_v26, %v2336_v26  ;;  %v740_v52 = vmul.f32 %v2359_v37, %v2359_v37  ;;  %v4638_v43 = vld [vmem:[#allocation12_spill] sm:$0xff] }
  0x68   : > { %v727_v53 = vmul.f32 %v2341_v29, %v2341_v29  ;;  %v804_v41 = vadd.f32 %v803_v57, %v725_v28  ;;  %v824_v58 = vadd.f32 %v739_v24, %v738_v3  ;;  %v733_v33 = vmul.f32 %v2302_v13, %v2302_v13  ;;  %v4643_v3 = vld [vmem:[#allocation17_spill] sm:$0xff] }
  0x69   : > { %672 = vadd.xlane.f32.xlu0 %v671_v30  ;;  %v813_v34 = vsel %vm387_vm0, %v732_v2, 0.0  ;;  %v741_v51 = vmul.f32 %v2362_v38, %v2362_v38  ;;  %v734_v26 = vmul.f32 %v2305_v14, %v2305_v14  ;;  %v735_v37 = vmul.f32 %v2308_v15, %v2308_v15 }
  0x6a   : > { %v812_v19 = vadd.f32 %v811_v21, %v731_v18  ;;  %v742_v29 = vmul.f32 %v2365_v39, %v2365_v39  ;;  %v825_v9 = vadd.f32 %v824_v58, %v740_v52  ;;  %v736_v13 = vmul.f32 %v2311_v16, %v2311_v16  ;;  %v4641_v18 = vld [vmem:[#allocation10_spill] sm:$0xff]  ;;  %v4645_v52 = vld [vmem:[#allocation19_spill] sm:$0xff] }
  0x6b   : > { %693 = vadd.xlane.f32.xlu1 %v692_v8  ;;  %v817_v30 = vadd.f32 %v734_v26, %v733_v33  ;;  %v748_v31 = vmul.f32 %v2396_v55, %v2396_v55  ;;  %v749_v38 = vmul.f32 %v2403_v60, %v2403_v60  ;;  %v750_v14 = vmul.f32 %v2406_v61, %v2406_v61  ;;  %v4646_v33 = vld [vmem:[#allocation15_spill] sm:$0xff] }
  0x6c   : > { %v713_v15 = vadd.f32 %v712_v27, %v711_v25  ;;  %v805_v54 = vadd.f32 %v804_v41, %v726_v10  ;;  %v806_v11 = vsel %vm387_vm0, %v727_v53, 0.0  ;;  %v737_v39 = vmul.f32 %v2314_v17, %v2314_v17  ;;  %v4640_v27 = vld [vmem:[#allocation14_spill] sm:$0xff] }
  0x6d   : > { %686 = vadd.xlane.f32.xlu0 %v685_v47  ;;  %v826_v16 = vadd.f32 %v825_v9, %v741_v51  ;;  %v818_v8 = vadd.f32 %v817_v30, %v735_v37  ;;  %v838_v36 = vadd.f32 %v749_v38, %v748_v31  ;;  %v743_v55 = vmul.f32 %v4638_v43, %v4638_v43  ;;  %v4642_v47 = vld [vmem:[#allocation11_spill] sm:$0xff]  ;;  %v4644_v25 = vld [vmem:[#allocation18_spill] sm:$0xff]  ;;  %v4647_v51 = vld [vmem:[#allocation16_spill] sm:$0xff] }
  0x6e   : > { %v814_v45 = vadd.f32 %v813_v34, %v812_v19  ;;  %v827_v60 = vsel %vm387_vm0, %v742_v29, 0.0  ;;  %v744_v61 = vmul.f32 %v4639_v46, %v4639_v46  ;;  %v745_v44 = vmul.f32 %v4640_v27, %v4640_v27  ;;  %v4648_v29 = vld [vmem:[#allocation22_spill] sm:$0xff]  ;;  %v4649_v30 = vld [vmem:[#allocation23_spill] sm:$0xff]  ;;  %v4650_v38 = vld [vmem:[#allocation24_spill] sm:$0xff] }
  0x6f   : > { %707 = vadd.xlane.f32.xlu1 %v706_v48  ;;  %v819_v28 = vadd.f32 %v818_v8, %v736_v13  ;;  %v751_v17 = vmul.f32 %v4641_v18, %v4641_v18  ;;  %v752_v2 = vmul.f32 %v4642_v47, %v4642_v47  ;;  %v839_v21 = vadd.f32 %v838_v36, %v750_v14  ;;  %v4656_v18 = vld [vmem:[#allocation26_spill] sm:$0xff] }
  0x70   : > { %v831_v57 = vadd.f32 %v744_v61, %v743_v55  ;;  %v758_v24 = vmul.f32 %v4643_v3, %v4643_v3  ;;  %v759_v10 = vmul.f32 %v4644_v25, %v4644_v25  ;;  %v760_v53 = vmul.f32 %v4645_v52, %v4645_v52  ;;  %v4653_v55 = vld [vmem:[#allocation28_spill] sm:$0xff]  ;;  %v4658_v25 = vld [vmem:[#allocation33_spill] sm:$0xff]  ;;  %v4659_v52 = vld [vmem:[#allocation34_spill] sm:$0xff] }
  0x71   : > { %700 = vadd.xlane.f32.xlu0 %v699_v35  ;;  %v807_v48 = vadd.f32 %v806_v11, %v805_v54  ;;  %v828_v41 = vadd.f32 %v827_v60, %v826_v16  ;;  %v820_v58 = vsel %vm387_vm0, %v737_v39, 0.0  ;;  %v746_v34 = vmul.f32 %v4646_v33, %v4646_v33  ;;  %v4651_v39 = vld [vmem:[#allocation21_spill] sm:$0xff] }
  0x72   : > { %v747_v26 = vmul.f32 %v4647_v51, %v4647_v51  ;;  %v832_v37 = vadd.f32 %v831_v57, %v745_v44  ;;  %v852_v19 = vadd.f32 %v759_v10, %v758_v24  ;;  %v753_v9 = vmul.f32 %v4648_v29, %v4648_v29  ;;  %v4654_v60 = vld [vmem:[#allocation29_spill] sm:$0xff] }
  0x73   : > { %721 = vadd.xlane.f32.xlu1 %v720_v12  ;;  %v841_v13 = vsel %vm387_vm0, %v752_v2, 0.0  ;;  %v761_v35 = vmul.f32 %v4611_v50, %v4611_v50  ;;  %v754_v31 = vmul.f32 %v4649_v30, %v4649_v30  ;;  %v755_v14 = vmul.f32 %v4650_v38, %v4650_v38  ;;  %v4652_v12 = vld [vmem:[#allocation27_spill] sm:$0xff]  ;;  %v4655_v44 = vld [vmem:[#allocation25_spill] sm:$0xff] }
  0x74   : > { %v821_v54 = vadd.f32 %v820_v58, %v819_v28  ;;  %v840_v11 = vadd.f32 %v839_v21, %v751_v17  ;;  %v762_v16 = vmul.f32 %v4651_v39, %v4651_v39  ;;  %v853_v8 = vadd.f32 %v852_v19, %v760_v53  ;;  %v4657_v21 = vld [vmem:[#allocation32_spill] sm:$0xff]  ;;  %v4660_v58 = vld [vmem:[#allocation30_spill] sm:$0xff]  ;;  %v4662_v19 = vld [vmem:[#allocation37_spill] sm:$0xff] }
  0x75   : > { %714 = vadd.xlane.f32.xlu0 %v713_v15  ;;  %v845_v36 = vadd.f32 %v754_v31, %v753_v9  ;;  %v768_v43 = vmul.f32 %v4652_v12, %v4652_v12  ;;  %v769_v50 = vmul.f32 %v4653_v55, %v4653_v55  ;;  %v770_v46 = vmul.f32 %v4654_v60, %v4654_v60  ;;  %v4663_v9 = vld [vmem:[#allocation38_spill] sm:$0xff] }
  0x76   : > { %v833_v61 = vadd.f32 %v832_v37, %v746_v34  ;;  %v834_v27 = vsel %vm387_vm0, %v747_v26, 0.0  ;;  %v756_v28 = vmul.f32 %v4655_v44, %v4655_v44  ;;  %v757_v17 = vmul.f32 %v4656_v18, %v4656_v18 }
  0x77   : > { %815 = vadd.xlane.f32.xlu1 %v814_v45  ;;  %v854_v15 = vadd.f32 %v853_v8, %v761_v35  ;;  %v846_v47 = vadd.f32 %v845_v36, %v755_v14  ;;  %v866_v2 = vadd.f32 %v769_v50, %v768_v43  ;;  %v763_v57 = vmul.f32 %v4657_v21, %v4657_v21  ;;  %v4661_v45 = vld [vmem:[#allocation31_spill] sm:$0xff]  ;;  %v4666_v8 = vld [vmem:[#allocation42_spill] sm:$0xff]  ;;  %v4668_v50 = vld [vmem:[#allocation44_spill] sm:$0xff] }
  0x78   : > { %v842_v3 = vadd.f32 %v841_v13, %v840_v11  ;;  %v855_v24 = vsel %vm387_vm0, %v762_v16, 0.0  ;;  %v764_v10 = vmul.f32 %v4658_v25, %v4658_v25  ;;  %v765_v53 = vmul.f32 %v4659_v52, %v4659_v52  ;;  %v4664_v35 = vld [vmem:[#allocation39_spill] sm:$0xff]  ;;  %v4665_v11 = vld [vmem:[#allocation36_spill] sm:$0xff]  ;;  %v4673_v25 = vld [vmem:[#allocation46_spill] sm:$0xff] }
  0x79   : > { %808 = vadd.xlane.f32.xlu0 %v807_v48  ;;  %v771_v33 = vmul.f32 %v4660_v58, %v4660_v58  ;;  %v772_v34 = vmul.f32 %v4661_v45, %v4661_v45  ;;  %v867_v51 = vadd.f32 %v866_v2, %v770_v46  ;;  %v766_v26 = vmul.f32 %v4621_v42, %v4621_v42  ;;  %v4674_v58 = vld [vmem:[#allocation52_spill] sm:$0xff] }
  0x7a   : > { %v859_v37 = vadd.f32 %v764_v10, %v763_v57  ;;  %v778_v29 = vmul.f32 %v4662_v19, %v4662_v19  ;;  %v779_v13 = vmul.f32 %v4663_v9, %v4663_v9  ;;  %v780_v48 = vmul.f32 %v4664_v35, %v4664_v35 }
  0x7b   : > { %829 = vadd.xlane.f32.xlu1 %v828_v41  ;;  %v835_v30 = vadd.f32 %v834_v27, %v833_v61  ;;  %v856_v31 = vadd.f32 %v855_v24, %v854_v15  ;;  %v847_v38 = vadd.f32 %v846_v47, %v756_v28  ;;  %v848_v14 = vsel %vm387_vm0, %v757_v17, 0.0  ;;  %v4667_v41 = vld [vmem:[#allocation43_spill] sm:$0xff]  ;;  %v4669_v27 = vld [vmem:[#allocation41_spill] sm:$0xff]  ;;  %v4671_v15 = vld [vmem:[#allocation48_spill] sm:$0xff] }
  0x7c   : > { %v767_v39 = vmul.f32 %v4665_v11, %v4665_v11  ;;  %v860_v42 = vadd.f32 %v859_v37, %v765_v53  ;;  %v880_v16 = vadd.f32 %v779_v13, %v778_v29  ;;  %v773_v36 = vmul.f32 %v4666_v8, %v4666_v8  ;;  %v4672_v47 = vld [vmem:[#allocation49_spill] sm:$0xff] }
  0x7d   : > { %822 = vadd.xlane.f32.xlu0 %v821_v54  ;;  %v869_v12 = vsel %vm387_vm0, %v772_v34, 0.0  ;;  %v781_v43 = vmul.f32 %v4628_v20, %v4628_v20  ;;  %v774_v55 = vmul.f32 %v4667_v41, %v4667_v41  ;;  %v775_v60 = vmul.f32 %v4668_v50, %v4668_v50  ;;  %v4670_v54 = vld [vmem:[#allocation47_spill] sm:$0xff] }
  0x7e   : > { %v868_v46 = vadd.f32 %v867_v51, %v771_v33  ;;  %v861_v61 = vadd.f32 %v860_v42, %v766_v26  ;;  %v782_v44 = vmul.f32 %v4669_v27, %v4669_v27  ;;  %v881_v28 = vadd.f32 %v880_v16, %v780_v48  ;;  %v4675_v51 = vld [vmem:[#allocation53_spill] sm:$0xff] }
  0x7f   : > { %843 = vadd.xlane.f32.xlu1 %v842_v3  ;;  %v873_v18 = vadd.f32 %v774_v55, %v773_v36  ;;  %v788_v17 = vmul.f32 %v4670_v54, %v4670_v54  ;;  %v789_v20 = vmul.f32 %v4671_v15, %v4671_v15  ;;  %v790_v2 = vmul.f32 %v4672_v47, %v4672_v47  ;;  %v4676_v48 = vld [vmem:[#allocation57_spill] sm:$0xff] }
  0x80   : > { %v849_v21 = vadd.f32 %v848_v14, %v847_v38  ;;  %v862_v57 = vsel %vm387_vm0, %v767_v39, 0.0  ;;  %v776_v24 = vmul.f32 %v4632_v56, %v4632_v56  ;;  %v777_v10 = vmul.f32 %v4673_v25, %v4673_v25 }
  0x81   : > { %836 = vadd.xlane.f32.xlu0 %v835_v30  ;;  %v882_v3 = vadd.f32 %v881_v28, %v781_v43  ;;  %v874_v52 = vadd.f32 %v873_v18, %v775_v60  ;;  %v894_v53 = vadd.f32 %v789_v20, %v788_v17  ;;  %v783_v33 = vmul.f32 %v4674_v58, %v4674_v58 }
  0x82   : > { %v870_v45 = vadd.f32 %v869_v12, %v868_v46  ;;  %v883_v34 = vsel %vm387_vm0, %v782_v44, 0.0  ;;  %v784_v26 = vmul.f32 %v4675_v51, %v4675_v51  ;;  %v785_v37 = vmul.f32 %v4631_v59, %v4631_v59 }
  0x83   : > { %857 = vadd.xlane.f32.xlu1 %v856_v31  ;;  %v863_v56 = vadd.f32 %v862_v57, %v861_v61  ;;  %v791_v19 = vmul.f32 %v4634_v23, %v4634_v23  ;;  %v792_v29 = vmul.f32 %v4630_v0, %v4630_v0  ;;  %v895_v9 = vadd.f32 %v894_v53, %v790_v2 }
  0x84   : > { %v887_v13 = vadd.f32 %v784_v26, %v783_v33  ;;  %v798_v35 = vmul.f32 %v2654_v22, %v2654_v22  ;;  %v799_v30 = vmul.f32 %v4676_v48, %v4676_v48  ;;  %v800_v38 = vmul.f32 %v4633_v63, %v4633_v63 }
  0x85   : > { %850 = vadd.xlane.f32.xlu0 %v849_v21  ;;  %v884_v59 = vadd.f32 %v883_v34, %v882_v3  ;;  %v875_v31 = vadd.f32 %v874_v52, %v776_v24  ;;  %v876_v14 = vsel %vm387_vm0, %v777_v10, 0.0  ;;  %v786_v23 = vmul.f32 %v4635_v49, %v4635_v49 }
  0x86   : > { %v787_v0 = vmul.f32 %v4636_v32, %v4636_v32  ;;  %v888_v11 = vadd.f32 %v887_v13, %v785_v37  ;;  %v908_v39 = vadd.f32 %v799_v30, %v798_v35  ;;  %v793_v22 = vmul.f32 %v2682_v62, %v2682_v62 }
  0x87   : > { %871 = vadd.xlane.f32.xlu1 %v870_v45  ;;  %v896_v42 = vadd.f32 %v895_v9, %v791_v19  ;;  %v801_v63 = vmul.f32 %v4637_v6, %v4637_v6  ;;  %v794_v16 = vmul.f32 %v2685_v7, %v2685_v7  ;;  %v795_v8 = vmul.f32 %v2688_v5, %v2688_v5 }
  0x88   : > { %v897_v49 = vsel %vm387_vm0, %v792_v29, 0.0  ;;  %v802_v32 = vmul.f32 %v2675_v4, %v2675_v4  ;;  %v909_v36 = vadd.f32 %v908_v39, %v800_v38  ;;  %v877_v12 = vadd.f32 %v876_v14, %v875_v31 }
  0x89   : > { %864 = vadd.xlane.f32.xlu0 %v863_v56  ;;  %v889_v62 = vadd.f32 %v888_v11, %v786_v23  ;;  %v796_v43 = vmul.f32 %v2697_v1, %v2697_v1  ;;  %v901_v41 = vadd.f32 %v794_v16, %v793_v22  ;;  %v890_v6 = vsel %vm387_vm0, %v787_v0, 0.0 }
  0x8a   : > { %v797_v7 = vmul.f32 %v2703_v40, %v2703_v40  ;;  %v898_v5 = vadd.f32 %v897_v49, %v896_v42  ;;  %v910_v55 = vadd.f32 %v909_v36, %v801_v63  ;;  %v911_v60 = vsel %vm387_vm0, %v802_v32, 0.0 }
  0x8b   : > { %885 = vadd.xlane.f32.xlu1 %v884_v59  ;;  %v902_v50 = vadd.f32 %v901_v41, %v795_v8  ;;  %v891_v4 = vadd.f32 %v890_v6, %v889_v62  ;;  %v498_v54 = vstv %s497_s28 }
  0x8c   : > { %v904_v61 = vsel %vm387_vm0, %v797_v7, 0.0  ;;  %v912_v27 = vadd.f32 %v911_v60, %v910_v55 }
  0x8d   : > { %878 = vadd.xlane.f32.xlu0 %v877_v12  ;;  %v903_v46 = vadd.f32 %v902_v50, %v796_v43 }
  0x8f   : > { %899 = vadd.xlane.f32.xlu1 %v898_v5  ;;  %v905_v1 = vadd.f32 %v904_v61, %v903_v46  ;;  %v1890_v46 = vld [vmem:[%s4341_s1 + $0x1] ss:$4 sm:$0x1f] }
  0x91   : > { %892 = vadd.xlane.f32.xlu0 %v891_v4 }
  0x93   : > { %913 = vadd.xlane.f32.xlu1 %v912_v27 }
  0x95   : > { %906 = vadd.xlane.f32.xlu0 %v905_v1 }
  0xb6   : > { %v405_v44 = vpop.xlane.xlu1 %404 }
  0xb7   : > { %v501_v15 = vadd.f32 %v498_v54, %v405_v44 }
  0xb9   : > { %v391_v40 = vpop.xlane.xlu0 %390  ;;  %v1895_v21 = vmul.f32 -1.442695, %v501_v15  ;;  %v4677_v15 = vld [vmem:[#allocation5_spill] sm:$0xff] }
  0xba   : > { %v499_v47 = vadd.f32 %v498_v54, %v391_v40 }
  0xbb   : > { %v412_v28 = vpop.xlane.xlu1 %411  ;;  %1948 = vpow2.f32 %v1895_v21  ;;  %v4678_v21 = vld [vmem:[#allocation6_spill] sm:$0xff] }
  0xbc   : > { %v502_v57 = vadd.f32 %v498_v54, %v412_v28  ;;  %v1893_v10 = vmul.f32 -1.442695, %v499_v47 }
  0xbd   : > { %v398_v18 = vpop.xlane.xlu0 %397 }
  0xbe   : > { %v500_v24 = vadd.f32 %v498_v54, %v398_v18  ;;  %v1896_v52 = vmul.f32 -1.442695, %v502_v57  ;;  %1950 = vpow2.f32 %v1893_v10  ;;  %v2999_v57 = vrot.slane %v1890_v46, %v4678_v21 }
  0xc0   : > { %v1894_v58 = vmul.f32 -1.442695, %v500_v24  ;;  %1952 = vpow2.f32 %v1896_v52  ;;  %v4679_v24 = vld [vmem:[#allocation7_spill] sm:$0xff]  ;;  %v4680_v52 = vld [vmem:[#allocation8_spill] sm:$0xff] }
  0xc1   : > { %v426_v17 = vpop.xlane.xlu1 %425 }
  0xc2   : > { %v504_v3 = vadd.f32 %v498_v54, %v426_v17  ;;  %1954 = vpow2.f32 %v1894_v58  ;;  %v1891_v17 = vld [vmem:[%s4341_s1 + $0x2] ss:$4 sm:$0x1f] }
  0xc3   : > { %v419_v20 = vpop.xlane.xlu0 %418  ;;  %v4681_v58 = vld [vmem:[#allocation9_spill] sm:$0xff] }
  0xc4   : > { %v503_v33 = vadd.f32 %v498_v54, %v419_v20  ;;  %v1898_v45 = vmul.f32 -1.442695, %v504_v3  ;;  %v2996_v20 = vrot.slane %v1890_v46, %v4677_v15 }
  0xc6   : > { %v440_v2 = vpop.xlane.xlu1 %439  ;;  %v1897_v19 = vmul.f32 -1.442695, %v503_v33  ;;  %1956 = vpow2.f32 %v1898_v45  ;;  %v3008_v33 = vrot.slane %v1890_v46, %v4681_v58 }
  0xc7   : > { %v506_v34 = vadd.f32 %v498_v54, %v440_v2 }
  0xc8   : > { %1958 = vpow2.f32 %v1897_v19  ;;  %v1949_v0 = vpop.eup %1948  ;;  %v3019_v19 = vrot.slane %v1891_v17, %v4678_v21 }
  0xc9   : > { %v433_v25 = vpop.xlane.xlu0 %432  ;;  %v1900_v9 = vmul.f32 -1.442695, %v506_v34  ;;  %v565_v16 = vadd.f32 1.0, %v1949_v0  ;;  %v3196_v0 = vld [vmem:[%s2296_s27 + $0xa0] sm:$0xff] }
  0xca   : > { %v505_v26 = vadd.f32 %v498_v54, %v433_v25  ;;  %v3002_v25 = vrot.slane %v1890_v46, %v4679_v24  ;;  %4696 = vst [vmem:[#allocation10_spill] sm:$0xff] %v3196_v0 }
  0xcb   : > { %1960 = vpow2.f32 %v1900_v9  ;;  %v1951_v22 = vpop.eup %1950 }
  0xcc   : > { %v454_v53 = vpop.xlane.xlu1 %453  ;;  %v1899_v35 = vmul.f32 -1.442695, %v505_v26  ;;  %v563_v62 = vadd.f32 1.0, %v1951_v22  ;;  %v3016_v26 = vrot.slane %v1891_v17, %v4677_v15 }
  0xcd   : > { %v508_v56 = vadd.f32 %v498_v54, %v454_v53  ;;  %v1953_v49 = vpop.eup %1952  ;;  %v3005_v53 = vrot.slane %v1890_v46, %v4680_v52 }
  0xce   : > { %v447_v51 = vpop.xlane.xlu0 %446  ;;  %1962 = vpow2.f32 %v1899_v35  ;;  %v566_v5 = vadd.f32 1.0, %v1953_v49  ;;  %v3027_v35 = vrot.slane %v1891_v17, %v4680_v52 }
  0xcf   : > { %v507_v37 = vadd.f32 %v498_v54, %v447_v51  ;;  %v1902_v30 = vmul.f32 -1.442695, %v508_v56  ;;  %v1955_v12 = vpop.eup %1954  ;;  %v1892_v51 = vld [vmem:[%s4341_s1 + $0x3] ss:$4 sm:$0x1f] }
  0xd0   : > { %v564_v55 = vadd.f32 1.0, %v1955_v12 }
  0xd1   : > { %v1901_v59 = vmul.f32 -1.442695, %v507_v37  ;;  %1964 = vpow2.f32 %v1902_v30 }
  0xd2   : > { %v468_v29 = vpop.xlane.xlu1 %467 }
  0xd3   : > { %v510_v13 = vadd.f32 %v498_v54, %v468_v29  ;;  %1966 = vpow2.f32 %v1901_v59  ;;  %v1957_v41 = vpop.eup %1956  ;;  %v3022_v29 = vrot.slane %v1891_v17, %v4679_v24  ;;  %v3038_v59 = vrot.slane %v1892_v51, %v4678_v21  ;;  %v3171_v21 = vld [vmem:[%s2296_s27 + $0xc8] sm:$0xff] }
  0xd4   : > { %v461_v48 = vpop.xlane.xlu0 %460  ;;  %v568_v4 = vadd.f32 1.0, %v1957_v41  ;;  %4692 = vst [vmem:[#allocation59_spill] sm:$0xff] %v3171_v21 }
  0xd5   : > { %v509_v38 = vadd.f32 %v498_v54, %v461_v48  ;;  %v1904_v11 = vmul.f32 -1.442695, %v510_v13  ;;  %v1959_v60 = vpop.eup %1958  ;;  %v3030_v48 = vrot.slane %v1891_v17, %v4681_v58  ;;  %v3112_v17 = vld [vmem:[%s2296_s27 + $0x18] sm:$0xff] }
  0xd6   : > { %v567_v18 = vadd.f32 1.0, %v1959_v60 }
  0xd7   : > { %v482_v31 = vpop.xlane.xlu1 %481  ;;  %v1903_v42 = vmul.f32 -1.442695, %v509_v38  ;;  %1968 = vpow2.f32 %v1904_v11  ;;  %v3035_v38 = vrot.slane %v1892_v51, %v4677_v15  ;;  %v3049_v11 = vrot.slane %v1892_v51, %v4680_v52  ;;  %v3156_v15 = vld [vmem:[%s2296_s27 + $0x98] sm:$0xff] }
  0xd8   : > { %v512_v14 = vadd.f32 %v498_v54, %v482_v31  ;;  %v1961_v61 = vpop.eup %1960  ;;  %v3041_v31 = vrot.slane %v1892_v51, %v4679_v24  ;;  %v3124_v24 = vld [vmem:[%s2296_s27 + $0x80] sm:$0xff]  ;;  %4689 = vst [vmem:[#allocation50_spill] sm:$0xff] %v3156_v15  ;;  %v3485_v15 = vld [vmem:[%s2296_s27 + $0x1b0] sm:$0xff] }
  0xd9   : > { %v475_v23 = vpop.xlane.xlu0 %474  ;;  %1970 = vpow2.f32 %v1903_v42  ;;  %v570_v2 = vadd.f32 1.0, %v1961_v61  ;;  %v3098_v61 = vld [vmem:[%s2296_s27 + $0x48] sm:$0xff]  ;;  %4751 = vst [vmem:[#allocation74_spill] sm:$0xff] %v3485_v15 }
  0xda   : > { %v511_v39 = vadd.f32 %v498_v54, %v475_v23  ;;  %v1906_v32 = vmul.f32 -1.442695, %v512_v14  ;;  %1972 = vrcp.f32 %v565_v16  ;;  %v3044_v23 = vld [vmem:[%s2296_s27 + $0x28] sm:$0xff] }
  0xdb   : > { %v1963_v44 = vpop.eup %1962 }
  0xdc   : > { %v496_v63 = vpop.xlane.xlu1 %495  ;;  %v1905_v6 = vmul.f32 -1.442695, %v511_v39  ;;  %1974 = vpow2.f32 %v1906_v32  ;;  %v569_v10 = vadd.f32 1.0, %v1963_v44  ;;  %v3052_v39 = vrot.slane %v1892_v51, %v4681_v58  ;;  %v3137_v51 = vld [vmem:[%s2296_s27 + $0x20] sm:$0xff] }
  0xdd   : > { %v514_v8 = vadd.f32 %v498_v54, %v496_v63  ;;  %1976 = vrcp.f32 %v563_v62  ;;  %v3057_v63 = vld [vmem:[%s2296_s27 + $0x30] sm:$0xff] }
  0xde   : > { %v489_v36 = vpop.xlane.xlu0 %488  ;;  %1978 = vpow2.f32 %v1905_v6  ;;  %v1965_v28 = vpop.eup %1964  ;;  %v3080_v6 = vld [vmem:[%s2296_s27 + $0x40] sm:$0xff] }
  0xdf   : > { %v513_v43 = vadd.f32 %v498_v54, %v489_v36  ;;  %v1908_v27 = vmul.f32 -1.442695, %v514_v8  ;;  %1980 = vrcp.f32 %v566_v5  ;;  %v572_v45 = vadd.f32 1.0, %v1965_v28  ;;  %v3066_v36 = vld [vmem:[%s2296_s27] sm:$0xff]  ;;  %v3107_v28 = vld [vmem:[%s2296_s27 + $0x10] sm:$0xff] }
  0xe0   : > { %v624_v7 = vpop.xlane.xlu1 %623  ;;  %1982 = vrcp.f32 %v564_v55  ;;  %v1967_v47 = vpop.eup %1966 }
  0xe1   : > { %v1907_v40 = vmul.f32 -1.442695, %v513_v43  ;;  %1984 = vrcp.f32 %v568_v4  ;;  %v3010_v34 = vmul.f32 0.0019493178, %v624_v7  ;;  %v571_v37 = vadd.f32 1.0, %v1967_v47  ;;  %v3075_v43 = vld [vmem:[%s2296_s27 + $0x38] sm:$0xff] }
  0xe2   : > { %v617_v50 = vpop.xlane.xlu0 %616  ;;  %1986 = vpow2.f32 %v1908_v27  ;;  %v3206_v7 = vld [vmem:[%s2296_s27 + $0x60] sm:$0xff] }
  0xe3   : > { %1988 = vpow2.f32 %v1907_v40  ;;  %v3024_v13 = vmul.f32 0.0019493178, %v617_v50  ;;  %v3072_v62 = vmul.f32 %v3010_v34, %v3010_v34  ;;  %v3087_v50 = vld [vmem:[%s2296_s27 + $0x8] sm:$0xff]  ;;  %4698 = vst [vmem:[#allocation17_spill] sm:$0xff] %v3206_v7 }
  0xe4   : > { %v638_v1 = vpop.xlane.xlu1 %637  ;;  %1990 = vrcp.f32 %v567_v18  ;;  %v1969_v9 = vpop.eup %1968 }
  0xe5   : > { %1992 = vrcp.f32 %v570_v2  ;;  %v574_v42 = vadd.f32 1.0, %v1969_v9  ;;  %v3061_v8 = vmul.f32 0.0019493178, %v638_v1  ;;  %v3095_v46 = vmul.f32 %v3024_v13, %v3024_v13  ;;  %v3142_v9 = vld [vmem:[%s2296_s27 + $0x88] sm:$0xff] }
  0xe6   : > { %v631_v54 = vpop.xlane.xlu0 %630  ;;  %1994 = vrcp.f32 %v569_v10  ;;  %v1971_v14 = vpop.eup %1970  ;;  %v3151_v10 = vld [vmem:[%s2296_s27 + $0x90] sm:$0xff] }
  0xe7   : > { %1996 = vrcp.f32 %v572_v45  ;;  %v3054_v22 = vpop.eup %1972  ;;  %v573_v55 = vadd.f32 1.0, %v1971_v14  ;;  %v3102_v44 = vmul.f32 0.0019493178, %v631_v54  ;;  %v3119_v54 = vld [vmem:[%s2296_s27 + $0x78] sm:$0xff]  ;;  %v3134_v45 = vmul.f32 %v3061_v8, %v3061_v8  ;;  %4688 = vst [vmem:[#allocation58_spill] sm:$0xff] %v3151_v10  ;;  %v3161_v14 = vld [vmem:[%s2296_s27 + $0x50] sm:$0xff] }
  0xe8   : > { %v652_v3 = vpop.xlane.xlu1 %651  ;;  %4682 = vst [vmem:[#allocation20_spill] sm:$0xff] %v3054_v22  ;;  %1998 = vrcp.f32 %v571_v37  ;;  %4690 = vst [vmem:[#allocation55_spill] sm:$0xff] %v3161_v14  ;;  %v3380_v14 = vld [vmem:[%s2296_s27 + $0x178] sm:$0xff]  ;;  %v3420_v10 = vld [vmem:[%s2296_s27 + $0x190] sm:$0xff] }
  0xe9   : > { %v1975_v32 = vpop.eup %1974  ;;  %4683 = vst [vmem:[#allocation35_spill] sm:$0xff] %v3102_v44  ;;  %v3104_v40 = vmul.f32 0.0019493178, %v652_v3  ;;  %2000 = vrcp.f32 %v574_v42  ;;  %v3177_v37 = vmul.f32 %v3102_v44, %v3102_v44  ;;  %4733 = vst [vmem:[#allocation6_spill] sm:$0xff] %v3380_v14 }
  0xea   : > { %v645_v56 = vpop.xlane.xlu0 %644  ;;  %v3084_v5 = vpop.eup %1976  ;;  %v576_v2 = vadd.f32 1.0, %v1975_v32  ;;  %2002 = vrcp.f32 %v573_v55  ;;  %v3180_v55 = vld [vmem:[%s2296_s27 + $0xd0] sm:$0xff]  ;;  %4740 = vst [vmem:[#allocation63_spill] sm:$0xff] %v3420_v10 }
  0xeb   : > { %v1979_v1 = vpop.eup %1978  ;;  %4684 = vst [vmem:[#allocation40_spill] sm:$0xff] %v3104_v40  ;;  %v3130_v58 = vmul.f32 0.0019493178, %v645_v56  ;;  %4693 = vst [vmem:[#allocation12_spill] sm:$0xff] %v3180_v55  ;;  %v3191_v12 = vmul.f32 %v3104_v40, %v3104_v40  ;;  %v3211_v55 = vld [vmem:[%s2296_s27 + $0x68] sm:$0xff] }
  0xec   : > { %v3032_v30 = vpop.xlane.xlu1 %665  ;;  %v3116_v47 = vpop.eup %1980  ;;  %v575_v56 = vadd.f32 1.0, %v1979_v1  ;;  %v3166_v1 = vld [vmem:[%s2296_s27 + $0x58] sm:$0xff]  ;;  %2004 = vrcp.f32 %v576_v2  ;;  %4699 = vst [vmem:[#allocation18_spill] sm:$0xff] %v3211_v55 }
  0xed   : > { %4685 = vst [vmem:[#allocation51_spill] sm:$0xff] %v3116_v47  ;;  %v3128_v52 = vpop.eup %1982  ;;  %4686 = vst [vmem:[#allocation54_spill] sm:$0xff] %v3130_v58  ;;  %v3185_v60 = vmul.f32 0.0019493178, %v3032_v30  ;;  %v3325_v47 = vld [vmem:[%s2296_s27 + $0x130] sm:$0xff] }
  0xee   : > { %v3063_v49 = vpop.xlane.xlu0 %658  ;;  %v3146_v42 = vpop.eup %1984  ;;  %4691 = vst [vmem:[#allocation56_spill] sm:$0xff] %v3166_v1  ;;  %2006 = vrcp.f32 %v575_v56  ;;  %v3229_v1 = vld [vmem:[%s2296_s27 + $0x70] sm:$0xff]  ;;  %v3269_v56 = vld [vmem:[%s2296_s27 + $0xe8] sm:$0xff]  ;;  %4722 = vst [vmem:[#allocation43_spill] sm:$0xff] %v3325_v47 }
  0xef   : > { %4687 = vst [vmem:[#allocation45_spill] sm:$0xff] %v3146_v42  ;;  %v1987_v18 = vpop.eup %1986  ;;  %4694 = vst [vmem:[#allocation13_spill] sm:$0xff] %v3185_v60  ;;  %v3201_v42 = vld [vmem:[%s2296_s27 + $0xa8] sm:$0xff]  ;;  %v3218_v0 = vmul.f32 0.0019493178, %v3063_v49  ;;  %v3274_v49 = vld [vmem:[%s2296_s27 + $0xb0] sm:$0xff] }
  0xf0   : > { %v3091_v4 = vpop.xlane.xlu1 %679  ;;  %v1989_v27 = vpop.eup %1988  ;;  %4697 = vst [vmem:[#allocation11_spill] sm:$0xff] %v3201_v42  ;;  %v578_v2 = vadd.f32 1.0, %v1987_v18  ;;  %v3224_v42 = vmul.f32 %v3130_v58, %v3130_v58  ;;  %4703 = vst [vmem:[#allocation22_spill] sm:$0xff] %v3229_v1  ;;  %v3239_v18 = vld [vmem:[%s2296_s27 + $0xe0] sm:$0xff]  ;;  %v3410_v58 = vld [vmem:[%s2296_s27 + $0x150] sm:$0xff] }
  0xf1   : > { %v3193_v16 = vpop.eup %1990  ;;  %4701 = vst [vmem:[#allocation15_spill] sm:$0xff] %v3218_v0  ;;  %v577_v7 = vadd.f32 1.0, %v1989_v27  ;;  %4705 = vst [vmem:[#allocation24_spill] sm:$0xff] %v3239_v18  ;;  %v3246_v27 = vld [vmem:[%s2296_s27 + $0x118] sm:$0xff]  ;;  %v3251_v1 = vld [vmem:[%s2296_s27 + $0x120] sm:$0xff] }
  0xf2   : > { %v673_v3 = vpop.xlane.xlu0 %672  ;;  %4695 = vst [vmem:[#allocation14_spill] sm:$0xff] %v3193_v16  ;;  %v3215_v21 = vpop.eup %1992  ;;  %v3234_v16 = vld [vmem:[%s2296_s27 + $0xd8] sm:$0xff]  ;;  %4707 = vst [vmem:[#allocation27_spill] sm:$0xff] %v3246_v27  ;;  %2008 = vrcp.f32 %v578_v2 }
  0xf3   : > { %4700 = vst [vmem:[#allocation19_spill] sm:$0xff] %v3215_v21  ;;  %v3226_v22 = vpop.eup %1994  ;;  %4704 = vst [vmem:[#allocation23_spill] sm:$0xff] %v3234_v16  ;;  %v3256_v16 = vmul.f32 0.0019493178, %v3091_v4  ;;  %v3262_v21 = vmul.f32 %v3185_v60, %v3185_v60  ;;  %v3266_v18 = vmul.f32 0.0019493178, %v673_v3  ;;  %2010 = vrcp.f32 %v577_v7 }
  0xf4   : > { %v3148_v32 = vpop.xlane.xlu1 %693  ;;  %4702 = vst [vmem:[#allocation16_spill] sm:$0xff] %v3226_v22  ;;  %v3243_v22 = vpop.eup %1996  ;;  %4708 = vst [vmem:[#allocation28_spill] sm:$0xff] %v3251_v1  ;;  %v3279_v1 = vld [vmem:[%s2296_s27 + $0xb8] sm:$0xff]  ;;  %v3284_v3 = vld [vmem:[%s2296_s27 + $0xf0] sm:$0xff] }
  0xf5   : > { %4706 = vst [vmem:[#allocation21_spill] sm:$0xff] %v3243_v22  ;;  %4709 = vst [vmem:[#allocation29_spill] sm:$0xff] %v3256_v16  ;;  %v3264_v22 = vpop.eup %1998  ;;  %v3289_v27 = vld [vmem:[%s2296_s27 + $0xf8] sm:$0xff]  ;;  %v3300_v2 = vmul.f32 0.0019493178, %v3148_v32  ;;  %v3348_v47 = vmul.f32 %v3256_v16, %v3256_v16  ;;  %v3368_v60 = vld [vmem:[%s2296_s27 + $0x110] sm:$0xff] }
  0xf6   : > { %v3187_v41 = vpop.xlane.xlu0 %686  ;;  %4710 = vst [vmem:[#allocation25_spill] sm:$0xff] %v3264_v22  ;;  %4711 = vst [vmem:[#allocation26_spill] sm:$0xff] %v3266_v18  ;;  %v3303_v22 = vld [vmem:[%s2296_s27 + $0xc0] sm:$0xff]  ;;  %v3334_v7 = vpop.eup %2000  ;;  %v3451_v16 = vld [vmem:[%s2296_s27 + $0x208] sm:$0xff] }
  0xf7   : > { %4712 = vst [vmem:[#allocation32_spill] sm:$0xff] %v3269_v56  ;;  %4713 = vst [vmem:[#allocation33_spill] sm:$0xff] %v3274_v49  ;;  %v3297_v49 = vmul.f32 %v3218_v0, %v3218_v0  ;;  %v3330_v56 = vld [vmem:[%s2296_s27 + $0x138] sm:$0xff] }
  0xf8   : > { %v3220_v30 = vpop.xlane.xlu1 %707  ;;  %4714 = vst [vmem:[#allocation34_spill] sm:$0xff] %v3279_v1  ;;  %4715 = vst [vmem:[#allocation30_spill] sm:$0xff] %v3284_v3  ;;  %v3308_v3 = vld [vmem:[%s2296_s27 + $0x128] sm:$0xff]  ;;  %v3318_v1 = vld [vmem:[%s2296_s27 + $0x170] sm:$0xff] }
  0xf9   : > { %4716 = vst [vmem:[#allocation31_spill] sm:$0xff] %v3289_v27  ;;  %4717 = vst [vmem:[#allocation37_spill] sm:$0xff] %v3300_v2  ;;  %v3313_v27 = vld [vmem:[%s2296_s27 + $0x168] sm:$0xff] }
  0xfa   : > { %v3258_v55 = vpop.xlane.xlu0 %700  ;;  %4718 = vst [vmem:[#allocation38_spill] sm:$0xff] %v3303_v22  ;;  %4719 = vst [vmem:[#allocation39_spill] sm:$0xff] %v3308_v3  ;;  %v3351_v3 = vld [vmem:[%s2296_s27 + $0x100] sm:$0xff]  ;;  %v3363_v22 = vld [vmem:[%s2296_s27 + $0x108] sm:$0xff] }
  0xfb   : > { %4720 = vst [vmem:[#allocation36_spill] sm:$0xff] %v3313_v27  ;;  %4721 = vst [vmem:[#allocation42_spill] sm:$0xff] %v3318_v1  ;;  %v3337_v27 = vld [vmem:[%s2296_s27 + $0x140] sm:$0xff]  ;;  %v3342_v1 = vld [vmem:[%s2296_s27 + $0x148] sm:$0xff] }
  0xfc   : > { %v3293_v4 = vpop.xlane.xlu1 %721  ;;  %4723 = vst [vmem:[#allocation44_spill] sm:$0xff] %v3330_v56  ;;  %4724 = vst [vmem:[#allocation41_spill] sm:$0xff] %v3334_v7  ;;  %v3356_v56 = vmul.f32 0.0019493178, %v3187_v41  ;;  %v3375_v41 = vld [vmem:[%s2296_s27 + $0x1b8] sm:$0xff] }
  0xfd   : > { %4725 = vst [vmem:[#allocation47_spill] sm:$0xff] %v3337_v27  ;;  %4726 = vst [vmem:[#allocation48_spill] sm:$0xff] %v3342_v1  ;;  %v3360_v27 = vmul.f32 %v3266_v18, %v3266_v18  ;;  %v3402_v1 = vld [vmem:[%s2296_s27 + $0x188] sm:$0xff]  ;;  %v3533_v18 = vld [vmem:[%s2296_s27 + $0x1f8] sm:$0xff] }
  0xfe   : > { %v3322_v40 = vpop.xlane.xlu0 %714  ;;  %4727 = vst [vmem:[#allocation49_spill] sm:$0xff] %v3351_v3  ;;  %4728 = vst [vmem:[#allocation46_spill] sm:$0xff] %v3356_v56  ;;  %v3372_v3 = vpop.eup %2002 }
  0xff   : > { %4729 = vst [vmem:[#allocation52_spill] sm:$0xff] %v3363_v22  ;;  %4730 = vst [vmem:[#allocation53_spill] sm:$0xff] %v3368_v60  ;;  %v3385_v22 = vld [vmem:[%s2296_s27 + $0x180] sm:$0xff]  ;;  %v3399_v60 = vmul.f32 %v3300_v2, %v3300_v2 }
 0x100   : > { %v816_v32 = vpop.xlane.xlu1 %815  ;;  %4731 = vst [vmem:[#allocation57_spill] sm:$0xff] %v3372_v3  ;;  %4732 = vst [vmem:[#allocation5_spill] sm:$0xff] %v3375_v41  ;;  %v3390_v3 = vld [vmem:[%s2296_s27 + $0x1c0] sm:$0xff] }
 0x101   : > { %v932_v44 = vmul.f32 0.0019493178, %v816_v32  ;;  %4734 = vst [vmem:[#allocation7_spill] sm:$0xff] %v3385_v22  ;;  %4735 = vst [vmem:[#allocation8_spill] sm:$0xff] %v3390_v3  ;;  %v3395_v32 = vmul.f32 0.0019493178, %v3220_v30  ;;  %v3406_v22 = vpop.eup %2004  ;;  %v3431_v30 = vmul.f32 %v3356_v56, %v3356_v56 }
 0x102   : > { %v809_v41 = vpop.xlane.xlu0 %808  ;;  %4736 = vst [vmem:[#allocation9_spill] sm:$0xff] %v3402_v1  ;;  %4737 = vst [vmem:[#allocation60_spill] sm:$0xff] %v3406_v22  ;;  %v3415_v3 = vld [vmem:[%s2296_s27 + $0x158] sm:$0xff]  ;;  %v3434_v22 = vld [vmem:[%s2296_s27 + $0x160] sm:$0xff] }
 0x103   : > { %v964_v14 = vsub.f32 %v932_v44, %v3072_v62  ;;  %v931_v0 = vmul.f32 0.0019493178, %v809_v41  ;;  %4738 = vst [vmem:[#allocation61_spill] sm:$0xff] %v3410_v58  ;;  %4739 = vst [vmem:[#allocation62_spill] sm:$0xff] %v3415_v3  ;;  %v3425_v62 = vld [vmem:[%s2296_s27 + $0x198] sm:$0xff]  ;;  %v3438_v3 = vpop.eup %2006  ;;  %v3441_v58 = vld [vmem:[%s2296_s27 + $0x1c8] sm:$0xff] }
 0x104   : > { %4741 = vst [vmem:[#allocation64_spill] sm:$0xff] %v3425_v62  ;;  %v830_v41 = vpop.xlane.xlu1 %829  ;;  %4742 = vst [vmem:[#allocation65_spill] sm:$0xff] %v3434_v22  ;;  %v3446_v62 = vld [vmem:[%s2296_s27 + $0x1d0] sm:$0xff]  ;;  %v3480_v1 = vld [vmem:[%s2296_s27 + $0x1a8] sm:$0xff] }
 0x105   : > { %4743 = vst [vmem:[#allocation66_spill] sm:$0xff] %v3438_v3  ;;  %v1060_v7 = vadd.f32 1e-05, %v964_v14  ;;  %v934_v10 = vmul.f32 0.0019493178, %v830_v41  ;;  %4744 = vst [vmem:[#allocation67_spill] sm:$0xff] %v3441_v58 }
 0x106   : > { %4745 = vst [vmem:[#allocation68_spill] sm:$0xff] %v3446_v62  ;;  %4746 = vst [vmem:[#allocation69_spill] sm:$0xff] %v3451_v16  ;;  %v3456_v3 = vmul.f32 0.0019493178, %v3258_v55  ;;  %v823_v14 = vpop.xlane.xlu0 %822  ;;  %v3459_v41 = vld [vmem:[%s2296_s27 + $0x1d8] sm:$0xff]  ;;  %v3464_v58 = vld [vmem:[%s2296_s27 + $0x1a0] sm:$0xff]  ;;  %v963_v55 = vsub.f32 %v931_v0, %v3095_v46  ;;  %v3489_v46 = vpop.eup %2008 }
 0x107   : > { %4747 = vst [vmem:[#allocation70_spill] sm:$0xff] %v3459_v41  ;;  %4748 = vst [vmem:[#allocation71_spill] sm:$0xff] %v3464_v58  ;;  %v3469_v62 = vld [vmem:[%s2296_s27 + $0x210] sm:$0xff]  ;;  %2012 = vrsqrt.f32 %v1060_v7  ;;  %v933_v16 = vmul.f32 0.0019493178, %v823_v14  ;;  %v966_v22 = vsub.f32 %v934_v10, %v3134_v45  ;;  %v3477_v41 = vmul.f32 %v3395_v32, %v3395_v32  ;;  %v3496_v14 = vld [vmem:[%s2296_s27 + $0x218] sm:$0xff] }
 0x108   : > { %4749 = vst [vmem:[#allocation72_spill] sm:$0xff] %v3469_v62  ;;  %v844_v44 = vpop.xlane.xlu1 %843  ;;  %4750 = vst [vmem:[#allocation73_spill] sm:$0xff] %v3480_v1  ;;  %v3492_v10 = vmul.f32 0.0019493178, %v3293_v4  ;;  %v3500_v62 = vpop.eup %2010  ;;  %v3503_v1 = vld [vmem:[%s2296_s27 + $0x1e0] sm:$0xff]  ;;  %v3508_v4 = vld [vmem:[%s2296_s27 + $0x1e8] sm:$0xff] }
 0x109   : > { %4752 = vst [vmem:[#allocation75_spill] sm:$0xff] %v3489_v46  ;;  %v965_v45 = vsub.f32 %v933_v16, %v3177_v37  ;;  %v936_v7 = vmul.f32 0.0019493178, %v844_v44  ;;  %4753 = vst [vmem:[#allocation76_spill] sm:$0xff] %v3496_v14  ;;  %v3514_v44 = vmul.f32 %v3456_v3, %v3456_v3  ;;  %v3517_v58 = vld [vmem:[%s2296_s27 + $0x220] sm:$0xff]  ;;  %v3523_v14 = vld [vmem:[%s2296_s27 + $0x228] sm:$0xff] }
 0x10a   : > { %4754 = vst [vmem:[#allocation77_spill] sm:$0xff] %v3500_v62  ;;  %4755 = vst [vmem:[#allocation78_spill] sm:$0xff] %v3503_v1  ;;  %v837_v37 = vpop.xlane.xlu0 %836  ;;  %v1059_v46 = vadd.f32 1e-05, %v963_v55  ;;  %v3528_v56 = vld [vmem:[%s2296_s27 + $0x1f0] sm:$0xff]  ;;  %v3598_v55 = vld [vmem:[%s2296_s27 + $0x248] sm:$0xff] }
 0x10b   : > { %4756 = vst [vmem:[#allocation79_spill] sm:$0xff] %v3508_v4  ;;  %v968_v0 = vsub.f32 %v936_v7, %v3191_v12  ;;  %v935_v1 = vmul.f32 0.0019493178, %v837_v37  ;;  %v1062_v4 = vadd.f32 1e-05, %v966_v22  ;;  %4757 = vst [vmem:[#allocation80_spill] sm:$0xff] %v3528_v56  ;;  %v3558_v22 = vmul.f32 %v3492_v10, %v3492_v10 }
 0x10c   : > { %v858_v15 = vpop.xlane.xlu1 %857  ;;  %4758 = vst [vmem:[#allocation81_spill] sm:$0xff] %v3533_v18  ;;  %v3538_v12 = vld [vmem:[%s2296_s27 + $0x200] sm:$0xff]  ;;  %v3543_v37 = vld [vmem:[%s2296_s27 + $0x258] sm:$0xff]  ;;  %v1061_v16 = vadd.f32 1e-05, %v965_v45  ;;  %2014 = vrsqrt.f32 %v1059_v46  ;;  %4767 = vst [vmem:[#allocation90_spill] sm:$0xff] %v3598_v55 }
 0x10d   : > { %4759 = vst [vmem:[#allocation82_spill] sm:$0xff] %v3538_v12  ;;  %4760 = vst [vmem:[#allocation83_spill] sm:$0xff] %v3543_v37  ;;  %v967_v62 = vsub.f32 %v935_v1, %v3224_v42  ;;  %v938_v2 = vmul.f32 0.0019493178, %v858_v15  ;;  %v3549_v56 = vld [vmem:[%s2296_s27 + $0x260] sm:$0xff]  ;;  %2016 = vrsqrt.f32 %v1062_v4  ;;  %v3562_v37 = vld [vmem:[%s2296_s27 + $0x268] sm:$0xff] }
 0x10e   : > { %4761 = vst [vmem:[#allocation84_spill] sm:$0xff] %v3549_v56  ;;  %v3554_v18 = vmul.f32 0.0019493178, %v3322_v40  ;;  %v1064_v7 = vadd.f32 1e-05, %v968_v0  ;;  %v851_v12 = vpop.xlane.xlu0 %850  ;;  %v3567_v0 = vld [vmem:[%s2296_s27 + $0x270] sm:$0xff]  ;;  %2018 = vrsqrt.f32 %v1061_v16 }
 0x10f   : > { %v1063_v42 = vadd.f32 1e-05, %v967_v62  ;;  %v970_v15 = vsub.f32 %v938_v2, %v3262_v21  ;;  %v937_v1 = vmul.f32 0.0019493178, %v851_v12  ;;  %4762 = vst [vmem:[#allocation85_spill] sm:$0xff] %v3567_v0  ;;  %v3572_v56 = vld [vmem:[%s2296_s27 + $0x278] sm:$0xff] }
 0x110   : > { %v872_v45 = vpop.xlane.xlu1 %871  ;;  %4763 = vst [vmem:[#allocation86_spill] sm:$0xff] %v3572_v56  ;;  %v3578_v4 = vld [vmem:[%s2296_s27 + $0x230] sm:$0xff]  ;;  %v3583_v40 = vld [vmem:[%s2296_s27 + $0x238] sm:$0xff]  ;;  %2020 = vrsqrt.f32 %v1064_v7  ;;  %v3589_v16 = vmul.f32 %v3554_v18, %v3554_v18  ;;  %v4770_v7 = vsub.f32 %v3075_v43, %v3010_v34 }
 0x111   : > { %v1066_v21 = vadd.f32 1e-05, %v970_v15  ;;  %v969_v2 = vsub.f32 %v937_v1, %v3297_v49  ;;  %v940_v46 = vmul.f32 0.0019493178, %v872_v45  ;;  %4764 = vst [vmem:[#allocation87_spill] sm:$0xff] %v3578_v4  ;;  %4765 = vst [vmem:[#allocation88_spill] sm:$0xff] %v3583_v40  ;;  %2022 = vrsqrt.f32 %v1063_v42 }
 0x112   : > { %v865_v62 = vpop.xlane.xlu0 %864  ;;  %v3593_v4 = vld [vmem:[%s2296_s27 + $0x240] sm:$0xff]  ;;  %v3603_v40 = vld [vmem:[%s2296_s27 + $0x250] sm:$0xff] }
 0x113   : > { %v1065_v49 = vadd.f32 1e-05, %v969_v2  ;;  %v972_v15 = vsub.f32 %v940_v46, %v3348_v47  ;;  %v939_v1 = vmul.f32 0.0019493178, %v865_v62  ;;  %2024 = vrsqrt.f32 %v1066_v21  ;;  %4766 = vst [vmem:[#allocation89_spill] sm:$0xff] %v3593_v4 }
 0x114   : > { %v2013_v45 = vpop.eup %2012  ;;  %v886_v12 = vpop.xlane.xlu1 %885  ;;  %v4768_v46 = vsub.f32 %v3044_v23, %v3010_v34  ;;  %v4769_v4 = vsub.f32 %v3057_v63, %v3010_v34  ;;  %v4772_v23 = vsub.f32 %v3098_v61, %v3010_v34 }
 0x115   : > { %2026 = vrsqrt.f32 %v1065_v49  ;;  %v1068_v47 = vadd.f32 1e-05, %v972_v15  ;;  %v971_v62 = vsub.f32 %v939_v1, %v3360_v27  ;;  %v942_v21 = vmul.f32 0.0019493178, %v886_v12 }
 0x116   : > { %v879_v2 = vpop.xlane.xlu0 %878  ;;  %v1096_v56 = vmul.f32 %v2013_v45, %v4768_v46  ;;  %v1097_v0 = vmul.f32 %v2013_v45, %v4769_v4  ;;  %v1098_v55 = vmul.f32 %v2013_v45, %v4770_v7  ;;  %v4771_v49 = vsub.f32 %v3080_v6, %v3010_v34 }
 0x117   : > { %2028 = vrsqrt.f32 %v1068_v47  ;;  %v1067_v27 = vadd.f32 1e-05, %v971_v62  ;;  %v974_v12 = vsub.f32 %v942_v21, %v3399_v60  ;;  %v941_v1 = vmul.f32 0.0019493178, %v879_v2 }
 0x118   : > { %v1099_v15 = vmul.f32 %v2013_v45, %v4771_v49  ;;  %v900_v42 = vpop.xlane.xlu1 %899  ;;  %v1100_v46 = vmul.f32 %v2013_v45, %v4772_v23  ;;  %v1202_v63 = vmul.f32 %v2996_v20, %v1096_v56  ;;  %v1203_v4 = vmul.f32 %v2999_v57, %v1097_v0 }
 0x119   : > { %v1204_v43 = vmul.f32 %v3002_v25, %v1098_v55  ;;  %2030 = vrsqrt.f32 %v1067_v27  ;;  %v1070_v7 = vadd.f32 1e-05, %v974_v12  ;;  %v973_v6 = vsub.f32 %v941_v1, %v3431_v30  ;;  %v2015_v55 = vpop.eup %2014 }
 0x11a   : > { %v944_v47 = vmul.f32 0.0019493178, %v900_v42  ;;  %v893_v62 = vpop.xlane.xlu0 %892  ;;  %v1205_v60 = vmul.f32 %v3005_v53, %v1099_v15  ;;  %v1206_v21 = vmul.f32 %v3008_v33, %v1100_v46  ;;  %v1308_v2 = vadd.f32 %v3016_v26, %v1202_v63  ;;  %v2017_v27 = vpop.eup %2016 }
 0x11b   : > { %v1309_v34 = vadd.f32 %v3019_v19, %v1203_v4  ;;  %2032 = vrsqrt.f32 %v1070_v7  ;;  %v1069_v61 = vadd.f32 1e-05, %v973_v6  ;;  %v943_v0 = vmul.f32 0.0019493178, %v893_v62  ;;  %v3638_v46 = vpop.eup %2018 }
 0x11c   : > { %v976_v56 = vsub.f32 %v944_v47, %v3477_v41  ;;  %v914_v45 = vpop.xlane.xlu1 %913  ;;  %v1310_v49 = vadd.f32 %v3022_v29, %v1204_v43  ;;  %v1311_v30 = vadd.f32 %v3027_v35, %v1205_v60  ;;  %v1312_v42 = vadd.f32 %v3030_v48, %v1206_v21 }
 0x11d   : > { %v1388_v15 = vmul.f32 %v3128_v52, %v1308_v2  ;;  %2034 = vrsqrt.f32 %v1069_v61  ;;  %v975_v1 = vsub.f32 %v943_v0, %v3514_v44  ;;  %v946_v23 = vmul.f32 0.0019493178, %v914_v45  ;;  %v3644_v6 = vpop.eup %2020 }
 0x11e   : > { %v1072_v12 = vadd.f32 1e-05, %v976_v56  ;;  %v907_v41 = vpop.xlane.xlu0 %906  ;;  %v1389_v63 = vmul.f32 %v3128_v52, %v1309_v34  ;;  %v1390_v4 = vmul.f32 %v3128_v52, %v1310_v49  ;;  %v1391_v43 = vmul.f32 %v3128_v52, %v1311_v30  ;;  %v3647_v44 = vpop.eup %2022 }
 0x11f   : > { %v1392_v7 = vmul.f32 %v3128_v52, %v1312_v42  ;;  %v1071_v47 = vadd.f32 1e-05, %v975_v1  ;;  %v978_v62 = vsub.f32 %v946_v23, %v3558_v22  ;;  %v945_v60 = vmul.f32 0.0019493178, %v907_v41 }
 0x120   : > { %2036 = vrsqrt.f32 %v1072_v12  ;;  %v1494_v21 = vmul.f32 %v3035_v38, %v1388_v15  ;;  %v1495_v2 = vmul.f32 %v3038_v59, %v1389_v63  ;;  %v1496_v34 = vmul.f32 %v3041_v31, %v1390_v4  ;;  %v3653_v56 = vpop.eup %2024 }
 0x121   : > { %v1497_v61 = vmul.f32 %v3049_v11, %v1391_v43  ;;  %2038 = vrsqrt.f32 %v1071_v47  ;;  %v1074_v52 = vadd.f32 1e-05, %v978_v62  ;;  %v977_v0 = vsub.f32 %v945_v60, %v3589_v16 }
 0x122   : > { %v1498_v45 = vmul.f32 %v3052_v39, %v1392_v7  ;;  %v3657_v22 = vpop.eup %2026  ;;  %v1576_v49 = vadd.f32 %v1495_v2, %v1494_v21  ;;  %v4773_v30 = vsub.f32 %v3066_v36, %v3024_v13  ;;  %v4774_v15 = vsub.f32 %v3087_v50, %v3024_v13 }
 0x123   : > { %v4775_v1 = vsub.f32 %v3107_v28, %v3024_v13  ;;  %2040 = vrsqrt.f32 %v1074_v52  ;;  %v1073_v41 = vadd.f32 1e-05, %v977_v0  ;;  %v4776_v63 = vsub.f32 %v3112_v17, %v3024_v13 }
 0x124   : > { %v1091_v42 = vmul.f32 %v2015_v55, %v4773_v30  ;;  %v1092_v12 = vmul.f32 %v2015_v55, %v4774_v15  ;;  %v1579_v16 = vsel %vm387_vm0, %v1498_v45, 0.0  ;;  %v3672_v43 = vpop.eup %2028  ;;  %v1577_v36 = vadd.f32 %v1576_v49, %v1496_v34 }
 0x125   : > { %v1093_v23 = vmul.f32 %v2015_v55, %v4775_v1  ;;  %v1094_v4 = vmul.f32 %v2015_v55, %v4776_v63  ;;  %v4777_v7 = vsub.f32 %v3137_v51, %v3024_v13  ;;  %2042 = vrsqrt.f32 %v1073_v41  ;;  %v4781_v63 = vld [vmem:[#allocation58_spill] sm:$0xff] }
 0x126   : > { %v1197_v47 = vmul.f32 %v2996_v20, %v1091_v42  ;;  %v1198_v28 = vmul.f32 %v2999_v57, %v1092_v12  ;;  %v4778_v17 = vsub.f32 %v3119_v54, %v3061_v8  ;;  %v3684_v2 = vpop.eup %2030  ;;  %v1578_v34 = vadd.f32 %v1577_v36, %v1497_v61  ;;  %v4783_v36 = vld [vmem:[#allocation50_spill] sm:$0xff] }
 0x127   : > { %v1095_v50 = vmul.f32 %v2015_v55, %v4777_v7  ;;  %v1199_v62 = vmul.f32 %v3002_v25, %v1093_v23  ;;  %v1200_v60 = vmul.f32 %v3005_v53, %v1094_v4  ;;  %v4779_v45 = vsub.f32 %v3124_v24, %v3061_v8 }
 0x128   : > { %v1106_v21 = vmul.f32 %v2017_v27, %v4778_v17  ;;  %v1303_v13 = vadd.f32 %v3016_v26, %v1197_v47  ;;  %v1304_v51 = vadd.f32 %v3019_v19, %v1198_v28  ;;  %v4780_v54 = vsub.f32 %v3142_v9, %v3061_v8  ;;  %v3697_v42 = vpop.eup %2032 }
 0x129   : > { %v1201_v52 = vmul.f32 %v3008_v33, %v1095_v50  ;;  %v1305_v55 = vadd.f32 %v3022_v29, %v1199_v62  ;;  %v1306_v0 = vadd.f32 %v3027_v35, %v1200_v60  ;;  %v1107_v49 = vmul.f32 %v2017_v27, %v4779_v45  ;;  %v4785_v45 = vld [vmem:[#allocation55_spill] sm:$0xff] }
 0x12a   : > { %v1108_v30 = vmul.f32 %v2017_v27, %v4780_v54  ;;  %v1580_v61 = vadd.f32 %v1579_v16, %v1578_v34  ;;  %v1383_v12 = vmul.f32 %v3084_v5, %v1303_v13  ;;  %v1384_v1 = vmul.f32 %v3084_v5, %v1304_v51  ;;  %v3710_v50 = vpop.eup %2034  ;;  %v4786_v54 = vld [vmem:[#allocation35_spill] sm:$0xff] }
 0x12b   : > { %v1307_v15 = vadd.f32 %v3030_v48, %v1201_v52  ;;  %v1385_v23 = vmul.f32 %v3084_v5, %v1305_v55  ;;  %v1386_v41 = vmul.f32 %v3084_v5, %v1306_v0  ;;  %v4782_v24 = vsub.f32 %v4781_v63, %v3061_v8 }
 0x12c   : > { %v4784_v9 = vsub.f32 %v4783_v36, %v3061_v8  ;;  %1581 = vadd.xlane.f32.xlu1 %v1580_v61  ;;  %v1489_v47 = vmul.f32 %v3035_v38, %v1383_v12  ;;  %v1490_v28 = vmul.f32 %v3038_v59, %v1384_v1  ;;  %v1212_v62 = vmul.f32 %v2996_v20, %v1106_v21  ;;  %v4789_v36 = vld [vmem:[#allocation56_spill] sm:$0xff] }
 0x12d   : > { %v1109_v4 = vmul.f32 %v2017_v27, %v4782_v24  ;;  %v1387_v16 = vmul.f32 %v3084_v5, %v1307_v15  ;;  %v1491_v60 = vmul.f32 %v3041_v31, %v1385_v23  ;;  %v1492_v17 = vmul.f32 %v3049_v11, %v1386_v41  ;;  %v4788_v41 = vld [vmem:[#allocation51_spill] sm:$0xff] }
 0x12e   : > { %v1110_v7 = vmul.f32 %v2017_v27, %v4784_v9  ;;  %v1213_v34 = vmul.f32 %v2999_v57, %v1107_v49  ;;  %v1214_v8 = vmul.f32 %v3002_v25, %v1108_v30  ;;  %v3720_v27 = vpop.eup %2036  ;;  %v1569_v13 = vadd.f32 %v1490_v28, %v1489_v47 }
 0x12f   : > { %v1493_v52 = vmul.f32 %v3052_v39, %v1387_v16  ;;  %v1215_v5 = vmul.f32 %v3005_v53, %v1109_v4  ;;  %v1318_v55 = vadd.f32 %v3016_v26, %v1212_v62  ;;  %v4787_v49 = vsub.f32 %v4785_v45, %v4786_v54  ;;  %v3732_v61 = vpop.eup %2038 }
 0x130   : > { %v1216_v51 = vmul.f32 %v3008_v33, %v1110_v7  ;;  %v1319_v21 = vadd.f32 %v3019_v19, %v1213_v34  ;;  %v1320_v0 = vadd.f32 %v3022_v29, %v1214_v8  ;;  %v1570_v15 = vadd.f32 %v1569_v13, %v1491_v60  ;;  %v3744_v16 = vpop.eup %2040  ;;  %v4791_v60 = vld [vmem:[#allocation17_spill] sm:$0xff] }
 0x131   : > { %v1101_v30 = vmul.f32 %v3638_v46, %v4787_v49  ;;  %v1572_v12 = vsel %vm387_vm0, %v1493_v52, 0.0  ;;  %v1321_v1 = vadd.f32 %v3027_v35, %v1215_v5  ;;  %v1398_v63 = vmul.f32 %v4788_v41, %v1318_v55 }
 0x132   : > { %v1322_v23 = vadd.f32 %v3030_v48, %v1216_v51  ;;  %v1399_v24 = vmul.f32 %v4788_v41, %v1319_v21  ;;  %v1400_v4 = vmul.f32 %v4788_v41, %v1320_v0  ;;  %v4790_v9 = vsub.f32 %v4789_v36, %v4786_v54  ;;  %v4793_v51 = vld [vmem:[#allocation18_spill] sm:$0xff]  ;;  %v3759_v21 = vpop.eup %2042 }
 0x133   : > { %v1571_v47 = vadd.f32 %v1570_v15, %v1492_v17  ;;  %v1401_v28 = vmul.f32 %v4788_v41, %v1321_v1  ;;  %v4792_v34 = vsub.f32 %v4791_v60, %v4786_v54  ;;  %v1504_v52 = vmul.f32 %v3035_v38, %v1398_v63  ;;  %v4795_v15 = vld [vmem:[#allocation22_spill] sm:$0xff] }
 0x134   : > { %v1102_v7 = vmul.f32 %v3638_v46, %v4790_v9  ;;  %v1402_v62 = vmul.f32 %v4788_v41, %v1322_v23  ;;  %v1505_v13 = vmul.f32 %v3038_v59, %v1399_v24  ;;  %v1506_v5 = vmul.f32 %v3041_v31, %v1400_v4 }
 0x135   : > { %v1103_v8 = vmul.f32 %v3638_v46, %v4792_v34  ;;  %v4794_v55 = vsub.f32 %v4793_v51, %v4786_v54  ;;  %v1573_v0 = vadd.f32 %v1572_v12, %v1571_v47  ;;  %v1507_v45 = vmul.f32 %v3049_v11, %v1401_v28  ;;  %v4797_v47 = vld [vmem:[#allocation59_spill] sm:$0xff]  ;;  %v4798_v28 = vld [vmem:[#allocation40_spill] sm:$0xff] }
 0x136   : > { %v1508_v49 = vmul.f32 %v3052_v39, %v1402_v62  ;;  %v4796_v1 = vsub.f32 %v4795_v15, %v4786_v54  ;;  %v1590_v41 = vadd.f32 %v1505_v13, %v1504_v52  ;;  %v1207_v63 = vmul.f32 %v2996_v20, %v1101_v30  ;;  %v4800_v52 = vld [vmem:[#allocation12_spill] sm:$0xff] }
 0x137   : > { %v1104_v17 = vmul.f32 %v3638_v46, %v4794_v55  ;;  %v1208_v24 = vmul.f32 %v2999_v57, %v1102_v7  ;;  %v1209_v4 = vmul.f32 %v3002_v25, %v1103_v8  ;;  %1574 = vadd.xlane.f32.xlu0 %v1573_v0  ;;  %v4799_v62 = vsub.f32 %v4797_v47, %v4798_v28  ;;  %v4802_v55 = vld [vmem:[#allocation23_spill] sm:$0xff] }
 0x138   : > { %v1105_v23 = vmul.f32 %v3638_v46, %v4796_v1  ;;  %v1593_v36 = vsel %vm387_vm0, %v1508_v49, 0.0  ;;  %v1591_v46 = vadd.f32 %v1590_v41, %v1506_v5  ;;  %v1313_v60 = vadd.f32 %v3016_v26, %v1207_v63  ;;  %v4804_v49 = vld [vmem:[#allocation20_spill] sm:$0xff] }
 0x139   : > { %v1210_v12 = vmul.f32 %v3005_v53, %v1104_v17  ;;  %v1116_v54 = vmul.f32 %v3644_v6, %v4799_v62  ;;  %v1314_v30 = vadd.f32 %v3019_v19, %v1208_v24  ;;  %v1315_v7 = vadd.f32 %v3022_v29, %v1209_v4  ;;  %v4805_v24 = vld [vmem:[#allocation24_spill] sm:$0xff] }
 0x13a   : > { %v1211_v9 = vmul.f32 %v3008_v33, %v1105_v23  ;;  %v4801_v13 = vsub.f32 %v4800_v52, %v4798_v28  ;;  %v4803_v17 = vsub.f32 %v4802_v55, %v4798_v28  ;;  %v1592_v0 = vadd.f32 %v1591_v46, %v1507_v45 }
 0x13b   : > { %v1316_v34 = vadd.f32 %v3027_v35, %v1210_v12  ;;  %v1393_v15 = vmul.f32 %v4804_v49, %v1313_v60  ;;  %v1394_v1 = vmul.f32 %v4804_v49, %v1314_v30  ;;  %v1395_v23 = vmul.f32 %v4804_v49, %v1315_v7 }
 0x13c   : > { %v1317_v8 = vadd.f32 %v3030_v48, %v1211_v9  ;;  %v1117_v51 = vmul.f32 %v3644_v6, %v4801_v13  ;;  %v1118_v5 = vmul.f32 %v3644_v6, %v4803_v17  ;;  %v4806_v4 = vsub.f32 %v4805_v24, %v4798_v28  ;;  %v4807_v9 = vld [vmem:[#allocation32_spill] sm:$0xff] }
 0x13d   : > { %v1396_v41 = vmul.f32 %v4804_v49, %v1316_v34  ;;  %v4808_v47 = vsub.f32 %v4807_v9, %v4798_v28  ;;  %v1594_v62 = vadd.f32 %v1593_v36, %v1592_v0  ;;  %v1499_v46 = vmul.f32 %v3035_v38, %v1393_v15  ;;  %v4810_v15 = vld [vmem:[#allocation54_spill] sm:$0xff] }
 0x13e   : > { %v1397_v63 = vmul.f32 %v4804_v49, %v1317_v8  ;;  %v1119_v12 = vmul.f32 %v3644_v6, %v4806_v4  ;;  %v1500_v60 = vmul.f32 %v3038_v59, %v1394_v1  ;;  %v1501_v30 = vmul.f32 %v3041_v31, %v1395_v23  ;;  %v4809_v49 = vld [vmem:[#allocation10_spill] sm:$0xff] }
 0x13f   : > { %v1120_v45 = vmul.f32 %v3644_v6, %v4808_v47  ;;  %v1502_v7 = vmul.f32 %v3049_v11, %v1396_v41  ;;  %v1222_v8 = vmul.f32 %v2996_v20, %v1116_v54  ;;  %v1223_v52 = vmul.f32 %v2999_v57, %v1117_v51  ;;  %1595 = vadd.xlane.f32.xlu1 %v1594_v62 }
 0x140   : > { %v1503_v34 = vmul.f32 %v3052_v39, %v1397_v63  ;;  %v1583_v13 = vadd.f32 %v1500_v60, %v1499_v46  ;;  %v1224_v28 = vmul.f32 %v3002_v25, %v1118_v5  ;;  %v1225_v6 = vmul.f32 %v3005_v53, %v1119_v12  ;;  %v4812_v63 = vld [vmem:[#allocation45_spill] sm:$0xff]  ;;  %v4813_v12 = vld [vmem:[#allocation11_spill] sm:$0xff] }
 0x141   : > { %v1226_v36 = vmul.f32 %v3008_v33, %v1120_v45  ;;  %v1328_v17 = vadd.f32 %v3016_v26, %v1222_v8  ;;  %v1329_v0 = vadd.f32 %v3019_v19, %v1223_v52  ;;  %v4811_v1 = vsub.f32 %v4809_v49, %v4810_v15  ;;  %v4815_v45 = vld [vmem:[#allocation33_spill] sm:$0xff] }
 0x142   : > { %v1586_v55 = vsel %vm387_vm0, %v1503_v34, 0.0  ;;  %v1584_v51 = vadd.f32 %v1583_v13, %v1501_v30  ;;  %v1330_v23 = vadd.f32 %v3022_v29, %v1224_v28  ;;  %v1331_v5 = vadd.f32 %v3027_v35, %v1225_v6  ;;  %v4817_v28 = vld [vmem:[#allocation34_spill] sm:$0xff] }
 0x143   : > { %v1111_v54 = vmul.f32 %v3647_v44, %v4811_v1  ;;  %v1332_v41 = vadd.f32 %v3030_v48, %v1226_v36  ;;  %v1408_v24 = vmul.f32 %v4812_v63, %v1328_v17  ;;  %v1409_v4 = vmul.f32 %v4812_v63, %v1329_v0  ;;  %v4819_v17 = vld [vmem:[#allocation38_spill] sm:$0xff] }
 0x144   : > { %v4814_v9 = vsub.f32 %v4813_v12, %v4810_v15  ;;  %v4816_v62 = vsub.f32 %v4815_v45, %v4810_v15  ;;  %v1585_v60 = vadd.f32 %v1584_v51, %v1502_v7  ;;  %v1410_v30 = vmul.f32 %v4812_v63, %v1330_v23  ;;  %v4822_v12 = vld [vmem:[#allocation13_spill] sm:$0xff] }
 0x145   : > { %v1411_v34 = vmul.f32 %v4812_v63, %v1331_v5  ;;  %v1412_v8 = vmul.f32 %v4812_v63, %v1332_v41  ;;  %v1514_v52 = vmul.f32 %v3035_v38, %v1408_v24  ;;  %v1515_v13 = vmul.f32 %v3038_v59, %v1409_v4 }
 0x146   : > { %v1112_v47 = vmul.f32 %v3647_v44, %v4814_v9  ;;  %v1113_v46 = vmul.f32 %v3647_v44, %v4816_v62  ;;  %v4818_v6 = vsub.f32 %v4817_v28, %v4810_v15  ;;  %v4820_v0 = vsub.f32 %v4819_v17, %v4810_v15  ;;  %v4828_v17 = vld [vmem:[#allocation14_spill] sm:$0xff] }
 0x147   : > { %v1587_v49 = vadd.f32 %v1586_v55, %v1585_v60  ;;  %v1516_v1 = vmul.f32 %v3041_v31, %v1410_v30  ;;  %v1517_v51 = vmul.f32 %v3049_v11, %v1411_v34  ;;  %v1518_v23 = vmul.f32 %v3052_v39, %v1412_v8  ;;  %v4821_v55 = vld [vmem:[#allocation27_spill] sm:$0xff]  ;;  %v4824_v34 = vld [vmem:[#allocation28_spill] sm:$0xff] }
 0x148   : > { %v1114_v36 = vmul.f32 %v3647_v44, %v4818_v6  ;;  %v1115_v7 = vmul.f32 %v3647_v44, %v4820_v0  ;;  %v1604_v5 = vadd.f32 %v1515_v13, %v1514_v52  ;;  %v1217_v41 = vmul.f32 %v2996_v20, %v1111_v54  ;;  %v4826_v13 = vld [vmem:[#allocation39_spill] sm:$0xff] }
 0x149   : > { %v1218_v63 = vmul.f32 %v2999_v57, %v1112_v47  ;;  %v1219_v24 = vmul.f32 %v3002_v25, %v1113_v46  ;;  %1588 = vadd.xlane.f32.xlu0 %v1587_v49  ;;  %v1607_v4 = vsel %vm387_vm0, %v1518_v23, 0.0  ;;  %v4823_v9 = vsub.f32 %v4821_v55, %v4822_v12 }
 0x14a   : > { %v1220_v15 = vmul.f32 %v3005_v53, %v1114_v36  ;;  %v1221_v44 = vmul.f32 %v3008_v33, %v1115_v7  ;;  %v1605_v62 = vadd.f32 %v1604_v5, %v1516_v1  ;;  %v1323_v60 = vadd.f32 %v3016_v26, %v1217_v41  ;;  %v4829_v5 = vld [vmem:[#allocation43_spill] sm:$0xff] }
 0x14b   : > { %v1126_v45 = vmul.f32 %v3653_v56, %v4823_v9  ;;  %v1324_v54 = vadd.f32 %v3019_v19, %v1218_v63  ;;  %v1325_v47 = vadd.f32 %v3022_v29, %v1219_v24  ;;  %v4825_v8 = vsub.f32 %v4824_v34, %v4822_v12  ;;  %v4831_v24 = vld [vmem:[#allocation44_spill] sm:$0xff] }
 0x14c   : > { %v1326_v46 = vadd.f32 %v3027_v35, %v1220_v15  ;;  %v1327_v30 = vadd.f32 %v3030_v48, %v1221_v44  ;;  %v4827_v28 = vsub.f32 %v4826_v13, %v4822_v12  ;;  %v1606_v36 = vadd.f32 %v1605_v62, %v1517_v51 }
 0x14d   : > { %v1127_v52 = vmul.f32 %v3653_v56, %v4825_v8  ;;  %v1403_v0 = vmul.f32 %v4828_v17, %v1323_v60  ;;  %v1404_v7 = vmul.f32 %v4828_v17, %v1324_v54  ;;  %v1405_v49 = vmul.f32 %v4828_v17, %v1325_v47 }
 0x14e   : > { %v1128_v6 = vmul.f32 %v3653_v56, %v4827_v28  ;;  %v1406_v1 = vmul.f32 %v4828_v17, %v1326_v46  ;;  %v1407_v23 = vmul.f32 %v4828_v17, %v1327_v30  ;;  %v4830_v41 = vsub.f32 %v4829_v5, %v4822_v12  ;;  %v4833_v28 = vld [vmem:[#allocation30_spill] sm:$0xff]  ;;  %v4837_v5 = vld [vmem:[#allocation31_spill] sm:$0xff] }
 0x14f   : > { %v4832_v15 = vsub.f32 %v4831_v24, %v4822_v12  ;;  %v1608_v44 = vadd.f32 %v1607_v4, %v1606_v36  ;;  %v1509_v55 = vmul.f32 %v3035_v38, %v1403_v0  ;;  %v1510_v9 = vmul.f32 %v3038_v59, %v1404_v7  ;;  %v4834_v36 = vld [vmem:[#allocation15_spill] sm:$0xff]  ;;  %v4839_v24 = vld [vmem:[#allocation49_spill] sm:$0xff] }
 0x150   : > { %v1129_v63 = vmul.f32 %v3653_v56, %v4830_v41  ;;  %v1511_v62 = vmul.f32 %v3041_v31, %v1405_v49  ;;  %v1512_v60 = vmul.f32 %v3049_v11, %v1406_v1  ;;  %v1513_v54 = vmul.f32 %v3052_v39, %v1407_v23  ;;  %v4836_v49 = vld [vmem:[#allocation19_spill] sm:$0xff] }
 0x151   : > { %v1130_v51 = vmul.f32 %v3653_v56, %v4832_v15  ;;  %v1232_v47 = vmul.f32 %v2996_v20, %v1126_v45  ;;  %v1233_v46 = vmul.f32 %v2999_v57, %v1127_v52  ;;  %1609 = vadd.xlane.f32.xlu1 %v1608_v44  ;;  %v1597_v30 = vadd.f32 %v1510_v9, %v1509_v55 }
 0x152   : > { %v1234_v12 = vmul.f32 %v3002_v25, %v1128_v6  ;;  %v1235_v56 = vmul.f32 %v3005_v53, %v1129_v63  ;;  %v1600_v34 = vsel %vm387_vm0, %v1513_v54, 0.0  ;;  %v4835_v17 = vsub.f32 %v4833_v28, %v4834_v36 }
 0x153   : > { %v1236_v4 = vmul.f32 %v3008_v33, %v1130_v51  ;;  %v1338_v8 = vadd.f32 %v3016_v26, %v1232_v47  ;;  %v1339_v13 = vadd.f32 %v3019_v19, %v1233_v46  ;;  %v1598_v52 = vadd.f32 %v1597_v30, %v1511_v62  ;;  %v4841_v46 = vld [vmem:[#allocation52_spill] sm:$0xff] }
 0x154   : > { %v1121_v45 = vmul.f32 %v3657_v22, %v4835_v17  ;;  %v1340_v0 = vadd.f32 %v3022_v29, %v1234_v12  ;;  %v1341_v6 = vadd.f32 %v3027_v35, %v1235_v56  ;;  %v4838_v41 = vsub.f32 %v4837_v5, %v4834_v36  ;;  %v4843_v56 = vld [vmem:[#allocation53_spill] sm:$0xff] }
 0x155   : > { %v1342_v7 = vadd.f32 %v3030_v48, %v1236_v4  ;;  %v1418_v1 = vmul.f32 %v4836_v49, %v1338_v8  ;;  %v1419_v23 = vmul.f32 %v4836_v49, %v1339_v13  ;;  %v4840_v15 = vsub.f32 %v4839_v24, %v4834_v36 }
 0x156   : > { %v1122_v63 = vmul.f32 %v3657_v22, %v4838_v41  ;;  %v1599_v44 = vadd.f32 %v1598_v52, %v1512_v60  ;;  %v1420_v55 = vmul.f32 %v4836_v49, %v1340_v0  ;;  %v1421_v9 = vmul.f32 %v4836_v49, %v1341_v6 }
 0x157   : > { %v1123_v51 = vmul.f32 %v3657_v22, %v4840_v15  ;;  %v1422_v62 = vmul.f32 %v4836_v49, %v1342_v7  ;;  %v1524_v54 = vmul.f32 %v3035_v38, %v1418_v1  ;;  %v1525_v47 = vmul.f32 %v3038_v59, %v1419_v23  ;;  %v4846_v1 = vld [vmem:[#allocation29_spill] sm:$0xff] }
 0x158   : > { %v4842_v30 = vsub.f32 %v4841_v46, %v4834_v36  ;;  %v4844_v4 = vsub.f32 %v4843_v56, %v4834_v36  ;;  %v1601_v8 = vadd.f32 %v1600_v34, %v1599_v44  ;;  %v1526_v13 = vmul.f32 %v3041_v31, %v1420_v55  ;;  %v4845_v34 = vld [vmem:[#allocation36_spill] sm:$0xff]  ;;  %v4848_v44 = vld [vmem:[#allocation42_spill] sm:$0xff] }
 0x159   : > { %v1527_v28 = vmul.f32 %v3049_v11, %v1421_v9  ;;  %v1528_v17 = vmul.f32 %v3052_v39, %v1422_v62  ;;  %v1618_v52 = vadd.f32 %v1525_v47, %v1524_v54  ;;  %v1227_v0 = vmul.f32 %v2996_v20, %v1121_v45  ;;  %v4850_v62 = vld [vmem:[#allocation6_spill] sm:$0xff] }
 0x15a   : > { %v1124_v12 = vmul.f32 %v3657_v22, %v4842_v30  ;;  %v1125_v60 = vmul.f32 %v3657_v22, %v4844_v4  ;;  %v1228_v6 = vmul.f32 %v2999_v57, %v1122_v63  ;;  %v1229_v7 = vmul.f32 %v3002_v25, %v1123_v51  ;;  %1602 = vadd.xlane.f32.xlu0 %v1601_v8  ;;  %v4852_v30 = vld [vmem:[#allocation16_spill] sm:$0xff] }
 0x15b   : > { %v1621_v49 = vsel %vm387_vm0, %v1528_v17, 0.0  ;;  %v4847_v23 = vsub.f32 %v4845_v34, %v4846_v1  ;;  %v1619_v41 = vadd.f32 %v1618_v52, %v1526_v13  ;;  %v1333_v24 = vadd.f32 %v3016_v26, %v1227_v0  ;;  %v4853_v13 = vld [vmem:[#allocation7_spill] sm:$0xff]  ;;  %v4855_v0 = vld [vmem:[#allocation9_spill] sm:$0xff] }
 0x15c   : > { %v1230_v36 = vmul.f32 %v3005_v53, %v1124_v12  ;;  %v1231_v22 = vmul.f32 %v3008_v33, %v1125_v60  ;;  %v1334_v45 = vadd.f32 %v3019_v19, %v1228_v6  ;;  %v1335_v63 = vadd.f32 %v3022_v29, %v1229_v7 }
 0x15d   : > { %v1136_v5 = vmul.f32 %v3672_v43, %v4847_v23  ;;  %v4849_v55 = vsub.f32 %v4848_v44, %v4846_v1  ;;  %v4851_v54 = vsub.f32 %v4850_v62, %v4846_v1  ;;  %v1620_v46 = vadd.f32 %v1619_v41, %v1527_v28  ;;  %v4858_v62 = vld [vmem:[#allocation26_spill] sm:$0xff] }
 0x15e   : > { %v1336_v15 = vadd.f32 %v3027_v35, %v1230_v36  ;;  %v1337_v51 = vadd.f32 %v3030_v48, %v1231_v22  ;;  %v1413_v12 = vmul.f32 %v4852_v30, %v1333_v24  ;;  %v1414_v56 = vmul.f32 %v4852_v30, %v1334_v45 }
 0x15f   : > { %v1137_v9 = vmul.f32 %v3672_v43, %v4849_v55  ;;  %v1138_v47 = vmul.f32 %v3672_v43, %v4851_v54  ;;  %v1415_v4 = vmul.f32 %v4852_v30, %v1335_v63  ;;  %v4854_v17 = vsub.f32 %v4853_v13, %v4846_v1  ;;  %v4857_v55 = vld [vmem:[#allocation47_spill] sm:$0xff] }
 0x160   : > { %v1416_v60 = vmul.f32 %v4852_v30, %v1336_v15  ;;  %v1417_v8 = vmul.f32 %v4852_v30, %v1337_v51  ;;  %v4856_v6 = vsub.f32 %v4855_v0, %v4846_v1  ;;  %v1622_v7 = vadd.f32 %v1621_v49, %v1620_v46 }
 0x161   : > { %v1139_v52 = vmul.f32 %v3672_v43, %v4854_v17  ;;  %v1519_v36 = vmul.f32 %v3035_v38, %v1413_v12  ;;  %v1520_v22 = vmul.f32 %v3038_v59, %v1414_v56  ;;  %v1521_v34 = vmul.f32 %v3041_v31, %v1415_v4  ;;  %v4860_v12 = vld [vmem:[#allocation21_spill] sm:$0xff] }
 0x162   : > { %v1140_v28 = vmul.f32 %v3672_v43, %v4856_v6  ;;  %v1522_v23 = vmul.f32 %v3049_v11, %v1416_v60  ;;  %v1523_v41 = vmul.f32 %v3052_v39, %v1417_v8  ;;  %v1242_v24 = vmul.f32 %v2996_v20, %v1136_v5  ;;  %1623 = vadd.xlane.f32.xlu1 %v1622_v7  ;;  %v4861_v60 = vld [vmem:[#allocation48_spill] sm:$0xff]  ;;  %v4863_v17 = vld [vmem:[#allocation61_spill] sm:$0xff] }
 0x163   : > { %v1243_v45 = vmul.f32 %v2999_v57, %v1137_v9  ;;  %v1611_v63 = vadd.f32 %v1520_v22, %v1519_v36  ;;  %v1244_v1 = vmul.f32 %v3002_v25, %v1138_v47  ;;  %v1245_v43 = vmul.f32 %v3005_v53, %v1139_v52 }
 0x164   : > { %v1246_v49 = vmul.f32 %v3008_v33, %v1140_v28  ;;  %v1614_v15 = vsel %vm387_vm0, %v1523_v41, 0.0  ;;  %v1348_v51 = vadd.f32 %v3016_v26, %v1242_v24  ;;  %v4859_v54 = vsub.f32 %v4857_v55, %v4858_v62  ;;  %v4865_v41 = vld [vmem:[#allocation62_spill] sm:$0xff] }
 0x165   : > { %v1349_v44 = vadd.f32 %v3019_v19, %v1243_v45  ;;  %v1612_v9 = vadd.f32 %v1611_v63, %v1521_v34  ;;  %v1350_v46 = vadd.f32 %v3022_v29, %v1244_v1  ;;  %v1351_v47 = vadd.f32 %v3027_v35, %v1245_v43  ;;  %v4867_v63 = vld [vmem:[#allocation65_spill] sm:$0xff] }
 0x166   : > { %v1131_v5 = vmul.f32 %v3684_v2, %v4859_v54  ;;  %v1352_v30 = vadd.f32 %v3030_v48, %v1246_v49  ;;  %v1428_v56 = vmul.f32 %v4860_v12, %v1348_v51  ;;  %v4862_v8 = vsub.f32 %v4861_v60, %v4858_v62 }
 0x167   : > { %v1429_v4 = vmul.f32 %v4860_v12, %v1349_v44  ;;  %v4864_v52 = vsub.f32 %v4863_v17, %v4858_v62  ;;  %v1613_v6 = vadd.f32 %v1612_v9, %v1522_v23  ;;  %v1430_v28 = vmul.f32 %v4860_v12, %v1350_v46 }
 0x168   : > { %v1132_v13 = vmul.f32 %v3684_v2, %v4862_v8  ;;  %v1431_v7 = vmul.f32 %v4860_v12, %v1351_v47  ;;  %v1432_v36 = vmul.f32 %v4860_v12, %v1352_v30  ;;  %v1534_v22 = vmul.f32 %v3035_v38, %v1428_v56  ;;  %v4870_v30 = vld [vmem:[#allocation37_spill] sm:$0xff] }
 0x169   : > { %v1133_v0 = vmul.f32 %v3684_v2, %v4864_v52  ;;  %v1535_v34 = vmul.f32 %v3038_v59, %v1429_v4  ;;  %v4866_v24 = vsub.f32 %v4865_v41, %v4858_v62  ;;  %v4868_v1 = vsub.f32 %v4867_v63, %v4858_v62  ;;  %v4872_v52 = vld [vmem:[#allocation8_spill] sm:$0xff] }
 0x16a   : > { %v1615_v43 = vadd.f32 %v1614_v15, %v1613_v6  ;;  %v1536_v49 = vmul.f32 %v3041_v31, %v1430_v28  ;;  %v1537_v51 = vmul.f32 %v3049_v11, %v1431_v7  ;;  %v1538_v44 = vmul.f32 %v3052_v39, %v1432_v36  ;;  %v4869_v15 = vld [vmem:[#allocation5_spill] sm:$0xff]  ;;  %v4874_v28 = vld [vmem:[#allocation67_spill] sm:$0xff] }
 0x16b   : > { %v1134_v45 = vmul.f32 %v3684_v2, %v4866_v24  ;;  %v1135_v23 = vmul.f32 %v3684_v2, %v4868_v1  ;;  %v1632_v55 = vadd.f32 %v1535_v34, %v1534_v22  ;;  %v1237_v54 = vmul.f32 %v2996_v20, %v1131_v5  ;;  %v4876_v34 = vld [vmem:[#allocation25_spill] sm:$0xff] }
 0x16c   : > { %v1238_v9 = vmul.f32 %v2999_v57, %v1132_v13  ;;  %v1239_v46 = vmul.f32 %v3002_v25, %v1133_v0  ;;  %1616 = vadd.xlane.f32.xlu0 %v1615_v43  ;;  %v1635_v47 = vsel %vm387_vm0, %v1538_v44, 0.0  ;;  %v4871_v12 = vsub.f32 %v4869_v15, %v4870_v30  ;;  %v4879_v44 = vld [vmem:[#allocation70_spill] sm:$0xff] }
 0x16d   : > { %v1240_v62 = vmul.f32 %v3005_v53, %v1134_v45  ;;  %v1241_v2 = vmul.f32 %v3008_v33, %v1135_v23  ;;  %v1633_v4 = vadd.f32 %v1632_v55, %v1536_v49  ;;  %v1343_v60 = vadd.f32 %v3016_v26, %v1237_v54  ;;  %v4877_v23 = vld [vmem:[#allocation68_spill] sm:$0xff] }
 0x16e   : > { %v1146_v56 = vmul.f32 %v3697_v42, %v4871_v12  ;;  %v1344_v5 = vadd.f32 %v3019_v19, %v1238_v9  ;;  %v1345_v8 = vadd.f32 %v3022_v29, %v1239_v46  ;;  %v4873_v0 = vsub.f32 %v4872_v52, %v4870_v30  ;;  %v4882_v52 = vld [vmem:[#allocation46_spill] sm:$0xff] }
 0x16f   : > { %v1346_v13 = vadd.f32 %v3027_v35, %v1240_v62  ;;  %v1347_v17 = vadd.f32 %v3030_v48, %v1241_v2  ;;  %v4875_v7 = vsub.f32 %v4874_v28, %v4870_v30  ;;  %v1634_v22 = vadd.f32 %v1633_v4, %v1537_v51 }
 0x170   : > { %v1147_v6 = vmul.f32 %v3697_v42, %v4873_v0  ;;  %v1423_v41 = vmul.f32 %v4876_v34, %v1343_v60  ;;  %v1424_v24 = vmul.f32 %v4876_v34, %v1344_v5  ;;  %v1425_v45 = vmul.f32 %v4876_v34, %v1345_v8 }
 0x171   : > { %v1148_v36 = vmul.f32 %v3697_v42, %v4875_v7  ;;  %v1426_v63 = vmul.f32 %v4876_v34, %v1346_v13  ;;  %v1427_v1 = vmul.f32 %v4876_v34, %v1347_v17  ;;  %v4878_v43 = vsub.f32 %v4877_v23, %v4870_v30  ;;  %v4881_v17 = vld [vmem:[#allocation63_spill] sm:$0xff] }
 0x172   : > { %v4880_v55 = vsub.f32 %v4879_v44, %v4870_v30  ;;  %v1636_v54 = vadd.f32 %v1635_v47, %v1634_v22  ;;  %v1529_v9 = vmul.f32 %v3035_v38, %v1423_v41  ;;  %v1530_v46 = vmul.f32 %v3038_v59, %v1424_v24  ;;  %v4884_v22 = vld [vmem:[#allocation41_spill] sm:$0xff]  ;;  %v4885_v24 = vld [vmem:[#allocation64_spill] sm:$0xff] }
 0x173   : > { %v1149_v49 = vmul.f32 %v3697_v42, %v4878_v43  ;;  %v1531_v62 = vmul.f32 %v3041_v31, %v1425_v45  ;;  %v1532_v2 = vmul.f32 %v3049_v11, %v1426_v63  ;;  %v1533_v15 = vmul.f32 %v3052_v39, %v1427_v1  ;;  %v4887_v1 = vld [vmem:[#allocation71_spill] sm:$0xff] }
 0x174   : > { %v1150_v51 = vmul.f32 %v3697_v42, %v4880_v55  ;;  %v1252_v12 = vmul.f32 %v2996_v20, %v1146_v56  ;;  %v1253_v4 = vmul.f32 %v2999_v57, %v1147_v6  ;;  %1637 = vadd.xlane.f32.xlu1 %v1636_v54  ;;  %v1625_v60 = vadd.f32 %v1530_v46, %v1529_v9  ;;  %v4889_v46 = vld [vmem:[#allocation73_spill] sm:$0xff] }
 0x175   : > { %v1254_v30 = vmul.f32 %v3002_v25, %v1148_v36  ;;  %v1255_v42 = vmul.f32 %v3005_v53, %v1149_v49  ;;  %v1628_v5 = vsel %vm387_vm0, %v1533_v15, 0.0  ;;  %v4883_v0 = vsub.f32 %v4881_v17, %v4882_v52 }
 0x176   : > { %v1256_v47 = vmul.f32 %v3008_v33, %v1150_v51  ;;  %v1358_v8 = vadd.f32 %v3016_v26, %v1252_v12  ;;  %v1359_v13 = vadd.f32 %v3019_v19, %v1253_v4  ;;  %v1626_v6 = vadd.f32 %v1625_v60, %v1531_v62  ;;  %v4891_v12 = vld [vmem:[#allocation74_spill] sm:$0xff] }
 0x177   : > { %v1141_v56 = vmul.f32 %v3710_v50, %v4883_v0  ;;  %v1360_v28 = vadd.f32 %v3022_v29, %v1254_v30  ;;  %v1361_v7 = vadd.f32 %v3027_v35, %v1255_v42  ;;  %v4886_v45 = vsub.f32 %v4885_v24, %v4882_v52 }
 0x178   : > { %v1362_v36 = vadd.f32 %v3030_v48, %v1256_v47  ;;  %v1438_v34 = vmul.f32 %v4884_v22, %v1358_v8  ;;  %v1439_v41 = vmul.f32 %v4884_v22, %v1359_v13  ;;  %v4888_v23 = vsub.f32 %v4887_v1, %v4882_v52 }
 0x179   : > { %v1142_v63 = vmul.f32 %v3710_v50, %v4886_v45  ;;  %v1627_v49 = vadd.f32 %v1626_v6, %v1532_v2  ;;  %v1440_v44 = vmul.f32 %v4884_v22, %v1360_v28  ;;  %v1441_v55 = vmul.f32 %v4884_v22, %v1361_v7  ;;  %v4895_v45 = vld [vmem:[#allocation72_spill] sm:$0xff] }
 0x17a   : > { %v1143_v43 = vmul.f32 %v3710_v50, %v4888_v23  ;;  %v1442_v51 = vmul.f32 %v4884_v22, %v1362_v36  ;;  %v1544_v54 = vmul.f32 %v3035_v38, %v1438_v34  ;;  %v1545_v9 = vmul.f32 %v3038_v59, %v1439_v41  ;;  %v4897_v23 = vld [vmem:[#allocation76_spill] sm:$0xff] }
 0x17b   : > { %v4890_v62 = vsub.f32 %v4889_v46, %v4882_v52  ;;  %v4892_v4 = vsub.f32 %v4891_v12, %v4882_v52  ;;  %v1629_v60 = vadd.f32 %v1628_v5, %v1627_v49  ;;  %v1546_v30 = vmul.f32 %v3041_v31, %v1440_v44  ;;  %v4893_v5 = vld [vmem:[#allocation69_spill] sm:$0xff] }
 0x17c   : > { %v1547_v42 = vmul.f32 %v3049_v11, %v1441_v55  ;;  %v1548_v47 = vmul.f32 %v3052_v39, %v1442_v51  ;;  %v1646_v8 = vadd.f32 %v1545_v9, %v1544_v54  ;;  %v1247_v13 = vmul.f32 %v2996_v20, %v1141_v56  ;;  %v4899_v55 = vld [vmem:[#allocation57_spill] sm:$0xff] }
 0x17d   : > { %v1144_v15 = vmul.f32 %v3710_v50, %v4890_v62  ;;  %v1145_v2 = vmul.f32 %v3710_v50, %v4892_v4  ;;  %v1248_v17 = vmul.f32 %v2999_v57, %v1142_v63  ;;  %v1249_v0 = vmul.f32 %v3002_v25, %v1143_v43  ;;  %1630 = vadd.xlane.f32.xlu0 %v1629_v60 }
 0x17e   : > { %v1649_v6 = vsel %vm387_vm0, %v1548_v47, 0.0  ;;  %v4894_v28 = vsub.f32 %v4893_v5, %v3395_v32  ;;  %v1647_v36 = vadd.f32 %v1646_v8, %v1546_v30  ;;  %v1353_v22 = vadd.f32 %v3016_v26, %v1247_v13  ;;  %v4902_v5 = vld [vmem:[#allocation78_spill] sm:$0xff] }
 0x17f   : > { %v1250_v52 = vmul.f32 %v3005_v53, %v1144_v15  ;;  %v1251_v50 = vmul.f32 %v3008_v33, %v1145_v2  ;;  %v1354_v56 = vadd.f32 %v3019_v19, %v1248_v17  ;;  %v1355_v34 = vadd.f32 %v3022_v29, %v1249_v0 }
 0x180   : > { %v1156_v7 = vmul.f32 %v3720_v27, %v4894_v28  ;;  %v4896_v63 = vsub.f32 %v4895_v45, %v3395_v32  ;;  %v4898_v43 = vsub.f32 %v4897_v23, %v3395_v32  ;;  %v1648_v44 = vadd.f32 %v1647_v36, %v1547_v42 }
 0x181   : > { %v1356_v41 = vadd.f32 %v3027_v35, %v1250_v52  ;;  %v1357_v24 = vadd.f32 %v3030_v48, %v1251_v50  ;;  %v1433_v51 = vmul.f32 %v4899_v55, %v1353_v22  ;;  %v1434_v54 = vmul.f32 %v4899_v55, %v1354_v56 }
 0x182   : > { %v1157_v1 = vmul.f32 %v3720_v27, %v4896_v63  ;;  %v1158_v49 = vmul.f32 %v3720_v27, %v4898_v43  ;;  %v1435_v9 = vmul.f32 %v4899_v55, %v1355_v34  ;;  %v4900_v15 = vsub.f32 %v3517_v58, %v3395_v32  ;;  %v4905_v63 = vld [vmem:[#allocation79_spill] sm:$0xff]  ;;  %v4907_v43 = vld [vmem:[#allocation80_spill] sm:$0xff] }
 0x183   : > { %v1436_v46 = vmul.f32 %v4899_v55, %v1356_v41  ;;  %v1437_v62 = vmul.f32 %v4899_v55, %v1357_v24  ;;  %v4901_v4 = vsub.f32 %v3523_v14, %v3395_v32  ;;  %v1650_v60 = vadd.f32 %v1649_v6, %v1648_v44  ;;  %v4904_v41 = vld [vmem:[#allocation60_spill] sm:$0xff] }
 0x184   : > { %v1159_v12 = vmul.f32 %v3720_v27, %v4900_v15  ;;  %v1539_v30 = vmul.f32 %v3035_v38, %v1433_v51  ;;  %v1540_v42 = vmul.f32 %v3038_v59, %v1434_v54  ;;  %v1541_v47 = vmul.f32 %v3041_v31, %v1435_v9  ;;  %v4909_v15 = vld [vmem:[#allocation81_spill] sm:$0xff] }
 0x185   : > { %v1160_v2 = vmul.f32 %v3720_v27, %v4901_v4  ;;  %v1542_v8 = vmul.f32 %v3049_v11, %v1436_v46  ;;  %v1543_v13 = vmul.f32 %v3052_v39, %v1437_v62  ;;  %v1262_v58 = vmul.f32 %v2996_v20, %v1156_v7  ;;  %1651 = vadd.xlane.f32.xlu1 %v1650_v60 }
 0x186   : > { %v1263_v17 = vmul.f32 %v2999_v57, %v1157_v1  ;;  %v1639_v0 = vadd.f32 %v1540_v42, %v1539_v30  ;;  %v1264_v32 = vmul.f32 %v3002_v25, %v1158_v49  ;;  %v1265_v14 = vmul.f32 %v3005_v53, %v1159_v12 }
 0x187   : > { %v1266_v27 = vmul.f32 %v3008_v33, %v1160_v2  ;;  %v1642_v6 = vsel %vm387_vm0, %v1543_v13, 0.0  ;;  %v1368_v52 = vadd.f32 %v3016_v26, %v1262_v58  ;;  %v4903_v28 = vsub.f32 %v4902_v5, %v3456_v3  ;;  %v4911_v2 = vld [vmem:[#allocation82_spill] sm:$0xff] }
 0x188   : > { %v1369_v50 = vadd.f32 %v3019_v19, %v1263_v17  ;;  %v1640_v36 = vadd.f32 %v1639_v0, %v1541_v47  ;;  %v1370_v22 = vadd.f32 %v3022_v29, %v1264_v32  ;;  %v1371_v56 = vadd.f32 %v3027_v35, %v1265_v14 }
 0x189   : > { %v1151_v7 = vmul.f32 %v3732_v61, %v4903_v28  ;;  %v1372_v34 = vadd.f32 %v3030_v48, %v1266_v27  ;;  %v1448_v24 = vmul.f32 %v4904_v41, %v1368_v52  ;;  %v4906_v1 = vsub.f32 %v4905_v63, %v3456_v3  ;;  %v4913_v27 = vld [vmem:[#allocation83_spill] sm:$0xff] }
 0x18a   : > { %v1449_v45 = vmul.f32 %v4904_v41, %v1369_v50  ;;  %v4908_v49 = vsub.f32 %v4907_v43, %v3456_v3  ;;  %v1641_v55 = vadd.f32 %v1640_v36, %v1542_v8  ;;  %v1450_v51 = vmul.f32 %v4904_v41, %v1370_v22 }
 0x18b   : > { %v1152_v23 = vmul.f32 %v3732_v61, %v4906_v1  ;;  %v1451_v54 = vmul.f32 %v4904_v41, %v1371_v56  ;;  %v1452_v9 = vmul.f32 %v4904_v41, %v1372_v34  ;;  %v1554_v46 = vmul.f32 %v3035_v38, %v1448_v24  ;;  %v4915_v56 = vld [vmem:[#allocation84_spill] sm:$0xff]  ;;  %v4918_v1 = vld [vmem:[#allocation66_spill] sm:$0xff] }
 0x18c   : > { %v1153_v44 = vmul.f32 %v3732_v61, %v4908_v49  ;;  %v1555_v62 = vmul.f32 %v3038_v59, %v1449_v45  ;;  %v4910_v12 = vsub.f32 %v4909_v15, %v3456_v3  ;;  %v4912_v60 = vsub.f32 %v4911_v2, %v3456_v3 }
 0x18d   : > { %v1643_v42 = vadd.f32 %v1642_v6, %v1641_v55  ;;  %v1556_v47 = vmul.f32 %v3041_v31, %v1450_v51  ;;  %v1557_v8 = vmul.f32 %v3049_v11, %v1451_v54  ;;  %v1558_v13 = vmul.f32 %v3052_v39, %v1452_v9  ;;  %v4919_v51 = vld [vmem:[#allocation85_spill] sm:$0xff] }
 0x18e   : > { %v1154_v4 = vmul.f32 %v3732_v61, %v4910_v12  ;;  %v1155_v30 = vmul.f32 %v3732_v61, %v4912_v60  ;;  %v1660_v58 = vadd.f32 %v1555_v62, %v1554_v46  ;;  %v1257_v17 = vmul.f32 %v2996_v20, %v1151_v7  ;;  %v4921_v46 = vld [vmem:[#allocation86_spill] sm:$0xff] }
 0x18f   : > { %v1258_v0 = vmul.f32 %v2999_v57, %v1152_v23  ;;  %v1259_v32 = vmul.f32 %v3002_v25, %v1153_v44  ;;  %1644 = vadd.xlane.f32.xlu0 %v1643_v42  ;;  %v1663_v14 = vsel %vm387_vm0, %v1558_v13, 0.0  ;;  %v4914_v6 = vsub.f32 %v4913_v27, %v3492_v10 }
 0x190   : > { %v1260_v3 = vmul.f32 %v3005_v53, %v1154_v4  ;;  %v1261_v61 = vmul.f32 %v3008_v33, %v1155_v30  ;;  %v1661_v50 = vadd.f32 %v1660_v58, %v1556_v47  ;;  %v1363_v5 = vadd.f32 %v3016_v26, %v1257_v17 }
 0x191   : > { %v1166_v52 = vmul.f32 %v3744_v16, %v4914_v6  ;;  %v1364_v28 = vadd.f32 %v3019_v19, %v1258_v0  ;;  %v1365_v7 = vadd.f32 %v3022_v29, %v1259_v32  ;;  %v4916_v34 = vsub.f32 %v4915_v56, %v3492_v10  ;;  %v4923_v32 = vld [vmem:[#allocation87_spill] sm:$0xff]  ;;  %v4928_v56 = vld [vmem:[#allocation89_spill] sm:$0xff] }
 0x192   : > { %v1366_v36 = vadd.f32 %v3027_v35, %v1260_v3  ;;  %v1367_v22 = vadd.f32 %v3030_v48, %v1261_v61  ;;  %v4917_v24 = vsub.f32 %v3562_v37, %v3492_v10  ;;  %v1662_v63 = vadd.f32 %v1661_v50, %v1557_v8  ;;  %v4925_v50 = vld [vmem:[#allocation75_spill] sm:$0xff] }
 0x193   : > { %v1167_v41 = vmul.f32 %v3744_v16, %v4916_v34  ;;  %v1443_v23 = vmul.f32 %v4918_v1, %v1363_v5  ;;  %v1444_v43 = vmul.f32 %v4918_v1, %v1364_v28  ;;  %v1445_v49 = vmul.f32 %v4918_v1, %v1365_v7  ;;  %v4926_v7 = vld [vmem:[#allocation88_spill] sm:$0xff] }
 0x194   : > { %v1168_v45 = vmul.f32 %v3744_v16, %v4917_v24  ;;  %v1446_v44 = vmul.f32 %v4918_v1, %v1366_v36  ;;  %v1447_v55 = vmul.f32 %v4918_v1, %v1367_v22  ;;  %v4920_v54 = vsub.f32 %v4919_v51, %v3492_v10 }
 0x195   : > { %v4922_v37 = vsub.f32 %v4921_v46, %v3492_v10  ;;  %v1664_v15 = vadd.f32 %v1663_v14, %v1662_v63  ;;  %v1549_v12 = vmul.f32 %v3035_v38, %v1443_v23  ;;  %v1550_v4 = vmul.f32 %v3038_v59, %v1444_v43 }
 0x196   : > { %v1169_v9 = vmul.f32 %v3744_v16, %v4920_v54  ;;  %v1551_v2 = vmul.f32 %v3041_v31, %v1445_v49  ;;  %v1552_v60 = vmul.f32 %v3049_v11, %v1446_v44  ;;  %v1553_v30 = vmul.f32 %v3052_v39, %v1447_v55  ;;  %v4930_v49 = vld [vmem:[#allocation90_spill] sm:$0xff] }
 0x197   : > { %v1170_v62 = vmul.f32 %v3744_v16, %v4922_v37  ;;  %v1272_v42 = vmul.f32 %v2996_v20, %v1166_v52  ;;  %v1273_v47 = vmul.f32 %v2999_v57, %v1167_v41  ;;  %1665 = vadd.xlane.f32.xlu1 %v1664_v15  ;;  %v1653_v8 = vadd.f32 %v1550_v4, %v1549_v12 }
 0x198   : > { %v1274_v10 = vmul.f32 %v3002_v25, %v1168_v45  ;;  %v1275_v16 = vmul.f32 %v3005_v53, %v1169_v9  ;;  %v1656_v58 = vsel %vm387_vm0, %v1553_v30, 0.0  ;;  %v4924_v14 = vsub.f32 %v4923_v32, %v3554_v18 }
 0x199   : > { %v1276_v13 = vmul.f32 %v3008_v33, %v1170_v62  ;;  %v1378_v17 = vadd.f32 %v3016_v26, %v1272_v42  ;;  %v1379_v0 = vadd.f32 %v3019_v19, %v1273_v47  ;;  %v1654_v61 = vadd.f32 %v1653_v8, %v1551_v2  ;;  %v4933_v47 = vld [vmem:[#allocation77_spill] sm:$0xff] }
 0x19a   : > { %v1161_v3 = vmul.f32 %v3759_v21, %v4924_v14  ;;  %v1380_v27 = vadd.f32 %v3022_v29, %v1274_v10  ;;  %v1381_v6 = vadd.f32 %v3027_v35, %v1275_v16  ;;  %v4927_v36 = vsub.f32 %v4926_v7, %v3554_v18 }
 0x19b   : > { %v1382_v52 = vadd.f32 %v3030_v48, %v1276_v13  ;;  %v1458_v5 = vmul.f32 %v4925_v50, %v1378_v17  ;;  %v1459_v28 = vmul.f32 %v4925_v50, %v1379_v0  ;;  %v4929_v34 = vsub.f32 %v4928_v56, %v3554_v18 }
 0x19c   : > { %v1162_v22 = vmul.f32 %v3759_v21, %v4927_v36  ;;  %v1655_v24 = vadd.f32 %v1654_v61, %v1552_v60  ;;  %v1460_v45 = vmul.f32 %v4925_v50, %v1380_v27  ;;  %v1461_v63 = vmul.f32 %v4925_v50, %v1381_v6 }
 0x19d   : > { %v1163_v41 = vmul.f32 %v3759_v21, %v4929_v34  ;;  %v1462_v1 = vmul.f32 %v4925_v50, %v1382_v52  ;;  %v1564_v23 = vmul.f32 %v3035_v38, %v1458_v5  ;;  %v1565_v43 = vmul.f32 %v3038_v59, %v1459_v28 }
 0x19e   : > { %v4931_v44 = vsub.f32 %v4930_v49, %v3554_v18  ;;  %v4932_v51 = vsub.f32 %v3603_v40, %v3554_v18  ;;  %v1657_v9 = vadd.f32 %v1656_v58, %v1655_v24  ;;  %v1566_v46 = vmul.f32 %v3041_v31, %v1460_v45 }
 0x19f   : > { %v1674_v37 = vadd.f32 %v1565_v43, %v1564_v23  ;;  %v1267_v62 = vmul.f32 %v2996_v20, %v1161_v3  ;;  %v1268_v15 = vmul.f32 %v2999_v57, %v1162_v22  ;;  %v1269_v12 = vmul.f32 %v3002_v25, %v1163_v41 }
 0x1a0   : > { %v1164_v55 = vmul.f32 %v3759_v21, %v4931_v44  ;;  %v1165_v54 = vmul.f32 %v3759_v21, %v4932_v51  ;;  %1658 = vadd.xlane.f32.xlu0 %v1657_v9  ;;  %v1567_v4 = vmul.f32 %v3049_v11, %v1461_v63  ;;  %v1568_v2 = vmul.f32 %v3052_v39, %v1462_v1 }
 0x1a1   : > { %v1675_v40 = vadd.f32 %v1674_v37, %v1566_v46  ;;  %v1373_v21 = vadd.f32 %v3016_v26, %v1267_v62  ;;  %v1374_v30 = vadd.f32 %v3019_v19, %v1268_v15  ;;  %v1375_v20 = vadd.f32 %v3022_v29, %v1269_v12 }
 0x1a2   : > { %v1270_v60 = vmul.f32 %v3005_v53, %v1164_v55  ;;  %v1271_v18 = vmul.f32 %v3008_v33, %v1165_v54  ;;  %v1677_v33 = vsel %vm387_vm0, %v1568_v2, 0.0  ;;  %v4281_v61 = vstv %s1909_s8 }
 0x1a3   : > { %v1676_v42 = vadd.f32 %v1675_v40, %v1567_v4  ;;  %v1453_v8 = vmul.f32 %v4933_v47, %v1373_v21  ;;  %v1454_v10 = vmul.f32 %v4933_v47, %v1374_v30  ;;  %v1455_v53 = vmul.f32 %v4933_v47, %v1375_v20 }
 0x1a4   : > { %v1376_v57 = vadd.f32 %v3027_v35, %v1270_v60  ;;  %v1377_v25 = vadd.f32 %v3030_v48, %v1271_v18 }
 0x1a5   : > { %v1678_v19 = vadd.f32 %v1677_v33, %v1676_v42  ;;  %v1559_v29 = vmul.f32 %v3035_v38, %v1453_v8  ;;  %v1560_v35 = vmul.f32 %v3038_v59, %v1454_v10  ;;  %v1561_v48 = vmul.f32 %v3041_v31, %v1455_v53 }
 0x1a6   : > { %v1456_v16 = vmul.f32 %v4933_v47, %v1376_v57  ;;  %v1457_v26 = vmul.f32 %v4933_v47, %v1377_v25 }
 0x1a7   : > { %1679 = vadd.xlane.f32.xlu1 %v1678_v19  ;;  %v1667_v13 = vadd.f32 %v1560_v35, %v1559_v29 }
 0x1a8   : > { %v1563_v58 = vmul.f32 %v3052_v39, %v1457_v26  ;;  %v1562_v17 = vmul.f32 %v3049_v11, %v1456_v16 }
 0x1a9   : > { %v1668_v0 = vadd.f32 %v1667_v13, %v1561_v48 }
 0x1aa   : > { %v1670_v14 = vsel %vm387_vm0, %v1563_v58, 0.0 }
 0x1ab   : > { %v1669_v32 = vadd.f32 %v1668_v0, %v1562_v17 }
 0x1ad   : > { %v1671_v3 = vadd.f32 %v1670_v14, %v1669_v32 }
 0x1af   : > { %1672 = vadd.xlane.f32.xlu0 %v1671_v3 }
 0x1b5   : > { %v1582_v38 = vpop.xlane.xlu1 %1581 }
 0x1b6   : > { %v1684_v59 = vadd.f32 %v4281_v61, %v1582_v38 }
 0x1b8   : > { %v1911_v27 = vmul.f32 -1.442695, %v1684_v59 }
 0x1ba   : > { %2044 = vpow2.f32 %v1911_v27 }
 0x1c0   : > { %v1575_v31 = vpop.xlane.xlu0 %1574 }
 0x1c1   : > { %v1683_v39 = vadd.f32 %v4281_v61, %v1575_v31 }
 0x1c3   : > { %v1910_v6 = vmul.f32 -1.442695, %v1683_v39 }
 0x1c5   : > { %2046 = vpow2.f32 %v1910_v6 }
 0x1c7   : > { %v2045_v52 = vpop.eup %2044 }
 0x1c8   : > { %v1596_v11 = vpop.xlane.xlu1 %1595  ;;  %v1748_v5 = vadd.f32 1.0, %v2045_v52 }
 0x1c9   : > { %v1686_v50 = vadd.f32 %v4281_v61, %v1596_v11 }
 0x1ca   : > { %2048 = vrcp.f32 %v1748_v5 }
 0x1cb   : > { %v1913_v28 = vmul.f32 -1.442695, %v1686_v50 }
 0x1cd   : > { %2050 = vpow2.f32 %v1913_v28 }
 0x1d2   : > { %v1589_v7 = vpop.xlane.xlu0 %1588  ;;  %v2047_v22 = vpop.eup %2046 }
 0x1d3   : > { %v1685_v36 = vadd.f32 %v4281_v61, %v1589_v7  ;;  %v1747_v34 = vadd.f32 1.0, %v2047_v22 }
 0x1d5   : > { %v1912_v56 = vmul.f32 -1.442695, %v1685_v36 }
 0x1d7   : > { %2052 = vpow2.f32 %v1912_v56  ;;  %v2049_v45 = vpop.eup %2048 }
 0x1d8   : > { %2054 = vrcp.f32 %v1747_v34  ;;  %1796 = vst.msk [vmem:[%s4291_s13 + $0x8] sm:$0xff] %vm387_vm0, %v2049_v45 }
 0x1da   : > { %v1610_v41 = vpop.xlane.xlu1 %1609  ;;  %v2051_v63 = vpop.eup %2050 }
 0x1db   : > { %v1688_v24 = vadd.f32 %v4281_v61, %v1610_v41  ;;  %v1750_v23 = vadd.f32 1.0, %v2051_v63 }
 0x1dd   : > { %v1915_v1 = vmul.f32 -1.442695, %v1688_v24 }
 0x1df   : > { %2056 = vpow2.f32 %v1915_v1 }
 0x1e0   : > { %2058 = vrcp.f32 %v1750_v23 }
 0x1e3   : > { %v1603_v43 = vpop.xlane.xlu0 %1602 }
 0x1e4   : > { %v1687_v49 = vadd.f32 %v4281_v61, %v1603_v43  ;;  %v2053_v44 = vpop.eup %2052 }
 0x1e5   : > { %v2055_v51 = vpop.eup %2054  ;;  %v1749_v54 = vadd.f32 1.0, %v2053_v44 }
 0x1e6   : > { %v1914_v55 = vmul.f32 -1.442695, %v1687_v49  ;;  %1795 = vst.msk [vmem:[%s4291_s13] sm:$0xff] %vm387_vm0, %v2055_v51 }
 0x1e8   : > { %2060 = vpow2.f32 %v1914_v55 }
 0x1e9   : > { %2062 = vrcp.f32 %v1749_v54 }
 0x1eb   : > { %v1624_v9 = vpop.xlane.xlu1 %1623 }
 0x1ec   : > { %v1690_v46 = vadd.f32 %v4281_v61, %v1624_v9  ;;  %v2057_v37 = vpop.eup %2056 }
 0x1ed   : > { %v2059_v15 = vpop.eup %2058  ;;  %v1752_v12 = vadd.f32 1.0, %v2057_v37 }
 0x1ee   : > { %v1917_v62 = vmul.f32 -1.442695, %v1690_v46  ;;  %1798 = vst.msk [vmem:[%s4291_s13 + $0x18] sm:$0xff] %vm387_vm0, %v2059_v15 }
 0x1f0   : > { %2064 = vpow2.f32 %v1917_v62 }
 0x1f1   : > { %2066 = vrcp.f32 %v1752_v12 }
 0x1f5   : > { %v1617_v4 = vpop.xlane.xlu0 %1616  ;;  %v2061_v60 = vpop.eup %2060 }
 0x1f6   : > { %v1689_v2 = vadd.f32 %v4281_v61, %v1617_v4  ;;  %v2063_v40 = vpop.eup %2062  ;;  %v1751_v21 = vadd.f32 1.0, %v2061_v60 }
 0x1f7   : > { %1797 = vst.msk [vmem:[%s4291_s13 + $0x10] sm:$0xff] %vm387_vm0, %v2063_v40 }
 0x1f8   : > { %v1916_v18 = vmul.f32 -1.442695, %v1689_v2 }
 0x1fa   : > { %2068 = vpow2.f32 %v1916_v18 }
 0x1fb   : > { %2070 = vrcp.f32 %v1751_v21 }
 0x1fd   : > { %v1638_v30 = vpop.xlane.xlu1 %1637  ;;  %v2065_v57 = vpop.eup %2064 }
 0x1fe   : > { %v1692_v20 = vadd.f32 %v4281_v61, %v1638_v30  ;;  %v2067_v42 = vpop.eup %2066  ;;  %v1754_v47 = vadd.f32 1.0, %v2065_v57 }
 0x1ff   : > { %1800 = vst.msk [vmem:[%s4291_s13 + $0x28] sm:$0xff] %vm387_vm0, %v2067_v42 }
 0x200   : > { %v1919_v25 = vmul.f32 -1.442695, %v1692_v20 }
 0x202   : > { %2072 = vpow2.f32 %v1919_v25 }
 0x203   : > { %2074 = vrcp.f32 %v1754_v47 }
 0x206   : > { %v1631_v8 = vpop.xlane.xlu0 %1630 }
 0x207   : > { %v1691_v10 = vadd.f32 %v4281_v61, %v1631_v8  ;;  %v2069_v53 = vpop.eup %2068 }
 0x208   : > { %v2071_v16 = vpop.eup %2070  ;;  %v1753_v26 = vadd.f32 1.0, %v2069_v53 }
 0x209   : > { %v1918_v33 = vmul.f32 -1.442695, %v1691_v10  ;;  %1799 = vst.msk [vmem:[%s4291_s13 + $0x20] sm:$0xff] %vm387_vm0, %v2071_v16 }
 0x20b   : > { %2076 = vpow2.f32 %v1918_v33 }
 0x20c   : > { %2078 = vrcp.f32 %v1753_v26 }
 0x20e   : > { %v1652_v19 = vpop.xlane.xlu1 %1651 }
 0x20f   : > { %v1694_v29 = vadd.f32 %v4281_v61, %v1652_v19  ;;  %v2073_v35 = vpop.eup %2072 }
 0x210   : > { %v2075_v13 = vpop.eup %2074  ;;  %v1756_v58 = vadd.f32 1.0, %v2073_v35 }
 0x211   : > { %v1921_v48 = vmul.f32 -1.442695, %v1694_v29  ;;  %1802 = vst.msk [vmem:[%s4291_s13 + $0x38] sm:$0xff] %vm387_vm0, %v2075_v13 }
 0x213   : > { %2080 = vpow2.f32 %v1921_v48 }
 0x214   : > { %2082 = vrcp.f32 %v1756_v58 }
 0x218   : > { %v1645_v17 = vpop.xlane.xlu0 %1644  ;;  %v2077_v32 = vpop.eup %2076 }
 0x219   : > { %v1693_v0 = vadd.f32 %v4281_v61, %v1645_v17  ;;  %v2079_v3 = vpop.eup %2078  ;;  %v1755_v38 = vadd.f32 1.0, %v2077_v32 }
 0x21a   : > { %1801 = vst.msk [vmem:[%s4291_s13 + $0x30] sm:$0xff] %vm387_vm0, %v2079_v3 }
 0x21b   : > { %v1920_v14 = vmul.f32 -1.442695, %v1693_v0 }
 0x21d   : > { %2084 = vpow2.f32 %v1920_v14 }
 0x21e   : > { %2086 = vrcp.f32 %v1755_v38 }
 0x220   : > { %v1666_v59 = vpop.xlane.xlu1 %1665  ;;  %v2081_v31 = vpop.eup %2080 }
 0x221   : > { %v1696_v27 = vadd.f32 %v4281_v61, %v1666_v59  ;;  %v2083_v6 = vpop.eup %2082  ;;  %v1758_v11 = vadd.f32 1.0, %v2081_v31 }
 0x222   : > { %1804 = vst.msk [vmem:[%s4291_s13 + $0x48] sm:$0xff] %vm387_vm0, %v2083_v6 }
 0x223   : > { %v1923_v39 = vmul.f32 -1.442695, %v1696_v27 }
 0x225   : > { %2088 = vpow2.f32 %v1923_v39 }
 0x226   : > { %2090 = vrcp.f32 %v1758_v11 }
 0x229   : > { %v1659_v52 = vpop.xlane.xlu0 %1658 }
 0x22a   : > { %v1695_v50 = vadd.f32 %v4281_v61, %v1659_v52  ;;  %v2085_v5 = vpop.eup %2084 }
 0x22b   : > { %v2087_v7 = vpop.eup %2086  ;;  %v1757_v36 = vadd.f32 1.0, %v2085_v5 }
 0x22c   : > { %v1922_v28 = vmul.f32 -1.442695, %v1695_v50  ;;  %1803 = vst.msk [vmem:[%s4291_s13 + $0x40] sm:$0xff] %vm387_vm0, %v2087_v7 }
 0x22e   : > { %2092 = vpow2.f32 %v1922_v28 }
 0x22f   : > { %2094 = vrcp.f32 %v1757_v36 }
 0x230   : > { %v1680_v22 = vpop.xlane.xlu1 %1679 }
 0x231   : > { %v1698_v56 = vadd.f32 %v4281_v61, %v1680_v22 }
 0x232   : > { %v2089_v34 = vpop.eup %2088 }
 0x233   : > { %v1925_v41 = vmul.f32 -1.442695, %v1698_v56  ;;  %v2091_v24 = vpop.eup %2090  ;;  %v1760_v45 = vadd.f32 1.0, %v2089_v34 }
 0x234   : > { %1806 = vst.msk [vmem:[%s4291_s13 + $0x58] sm:$0xff] %vm387_vm0, %v2091_v24 }
 0x235   : > { %2096 = vpow2.f32 %v1925_v41 }
 0x236   : > { %2098 = vrcp.f32 %v1760_v45 }
 0x238   : > { %v1673_v63 = vpop.xlane.xlu0 %1672 }
 0x239   : > { %v1697_v1 = vadd.f32 %v4281_v61, %v1673_v63 }
 0x23b   : > { %v2093_v23 = vpop.eup %2092  ;;  %v1924_v43 = vmul.f32 -1.442695, %v1697_v1 }
 0x23c   : > { %v2095_v49 = vpop.eup %2094  ;;  %v1759_v44 = vadd.f32 1.0, %v2093_v23 }
 0x23d   : > { %1805 = vst.msk [vmem:[%s4291_s13 + $0x50] sm:$0xff] %vm387_vm0, %v2095_v49  ;;  %2100 = vpow2.f32 %v1924_v43 }
 0x23e   : > { %2102 = vrcp.f32 %v1759_v44 }
 0x242   : > { %v2097_v55 = vpop.eup %2096 }
 0x243   : > { %v2099_v51 = vpop.eup %2098  ;;  %v1762_v54 = vadd.f32 1.0, %v2097_v55 }
 0x244   : > { %1808 = vst.msk [vmem:[%s4291_s13 + $0x68] sm:$0xff] %vm387_vm0, %v2099_v51 }
 0x245   : > { %2104 = vrcp.f32 %v1762_v54 }
 0x24a   : > { %v2101_v9 = vpop.eup %2100 }
 0x24b   : > { %v2103_v46 = vpop.eup %2102  ;;  %v1761_v61 = vadd.f32 1.0, %v2101_v9 }
 0x24c   : > { %1807 = vst.msk [vmem:[%s4291_s13 + $0x60] sm:$0xff] %vm387_vm0, %v2103_v46 }
 0x24d   : > { %2106 = vrcp.f32 %v1761_v61 }
 0x252   : > { %v2105_v37 = vpop.eup %2104 }
 0x253   : > { %1810 = vst.msk [vmem:[%s4291_s13 + $0x78] sm:$0xff] %vm387_vm0, %v2105_v37 }
 0x25a   : > { %v2107_v62 = vpop.eup %2106 }
 0x25b   : > { %1809 = vst.msk [vmem:[%s4291_s13 + $0x70] sm:$0xff] %vm387_vm0, %v2107_v62 }
 0x25c PF: > { %s14_s12 = sadd.s32 1, %s2213_s12  }
 0x25d   : > { %p11_p1 = scmp.ge.s32.totalorder %s14_s12, 4  }
 0x25f   :  { %13 = sbr.rel (!%p11_p1) target bundleno = 1 (0x1), region = 70 }
 0x264   :  { %1833 = vsyncpa [#allocation3], 1 }
 0x265   :  { %1835 = vsyncpa [#allocation3 + $0x1], 1 }

</bundles_post_ra>
